<compile_context>
chip_gen: v6e
topology: v6e:2x2x1
jax: 0.10.0
libtpu: 0.0.40
codegen_flags: <defaults>
</compile_context>

<pallas_src>
import numpy as np
import jax
import jax.numpy as jnp
from jax.experimental import pallas as pl
from jax.experimental.pallas import tpu as pltpu

CHARLM_START = "\n"
CHARLM_END = " "
VOCAB_SIZE = 64
PAD_ID = ord(CHARLM_END) % VOCAB_SIZE
LANE = 128
SUBLANE = 8


def _round_up(x, m):
    return ((x + m - 1) // m) * m


# ----------------------------------------------------------------- kernel ----

def _make_charlm_lstm_kernel(T, group_hp, group_off):
    """Build the fused multi-charlm LSTM kernel for a given group layout."""
    n_groups = len(group_hp)
    HC = sum(group_hp)
    G = 4 * HC

    def kernel(x_ref, lens_ref, wih_ref, b_ref, *rest):
        # x_ref:    (T, Bt, EC)  bf16 fused char embeddings (time-major)
        # lens_ref: (Bt, 1)      int32 word lengths (incl. start/end markers)
        # wih_ref:  (EC, 4*HC)   bf16 group/gate-blocked input weights
        # b_ref:    (1, 4*HC)    f32 group/gate-blocked bias
        # whh_refs: per group g, (Hg, 4*Hg) bf16 recurrent weights
        # out_ref:  (Bt, T, HC)  f32 batch-major masked hidden states
        # gx_ref:   (T, Bt, 4*HC) bf16 scratch for the hoisted input projection
        whh_refs = rest[:n_groups]
        out_ref = rest[n_groups]
        gx_ref = rest[n_groups + 1]

        Bt = x_ref.shape[1]
        EC = x_ref.shape[2]

        # Hoisted input projection: one (T*Bt, EC) @ (EC, 4HC) bf16 matmul with
        # f32 accumulation + bias, stored once to a bf16 scratch, instead of a
        # matmul + bias broadcast on every serialized time step.
        x2d = x_ref[...].reshape(T * Bt, EC)
        gx = jnp.dot(x2d, wih_ref[...], preferred_element_type=jnp.float32)
        gx_ref[...] = (gx + b_ref[...]).reshape(T, Bt, G).astype(gx_ref.dtype)

        lens_v = lens_ref[...]                                   # (Bt, 1) i32
        whh = [whh_refs[g][...] for g in range(n_groups)]        # hoist loads

        def step(t, carry):
            gx_t = gx_ref[t]                                     # (Bt, G)
            m = (lens_v > t).astype(jnp.float32)                 # (Bt, 1)
            new = []
            for g in range(n_groups):
                h_g, c_g = carry[g]
                Hg = group_hp[g]
                go = group_off[g]
                # Per-group recurrent dot: only this group's (Hg x 4Hg) block,
                # no MACs on cross-group zeros.  Gate math stays f32.
                gates = (
                    gx_t[:, 4 * go:4 * go + 4 * Hg]
                    + jnp.dot(h_g.astype(whh[g].dtype), whh[g],
                              preferred_element_type=jnp.float32)
                )
                i_g = jax.nn.sigmoid(gates[:, 0 * Hg:1 * Hg])
                f_g = jax.nn.sigmoid(gates[:, 1 * Hg:2 * Hg])
                g_g = jnp.tanh(gates[:, 2 * Hg:3 * Hg])
                o_g = jax.nn.sigmoid(gates[:, 3 * Hg:4 * Hg])
                c_g = f_g * c_g + i_g * g_g
                h_g = o_g * jnp.tanh(c_g)
                # Masked, lane-aligned batch-major store (matches torch.zeros
                # padding of the adapter); no glue transpose needed afterwards.
                hm = h_g * m
                out_ref[:, pl.ds(t, 1), go:go + Hg] = (
                    hm[:, None, :].astype(out_ref.dtype))
                new.append((h_g, c_g))
            return tuple(new)

        init = tuple(
            (jnp.zeros((Bt, Hg), jnp.float32), jnp.zeros((Bt, Hg), jnp.float32))
            for Hg in group_hp)

        if T <= 32:
            # Words are short; a static unroll keeps all indices constant.
            carry = init
            for t in range(T):
                carry = step(t, carry)
        else:
            # Long-T path: bounded unroll, state flows through out_ref.
            jax.lax.fori_loop(0, T, step, init, unroll=8)

    return kernel


def _vmem_limit_bytes(T, b_tile, EC, HC, group_hp):
    """Explicit scoped-VMEM budget from the actual block/scratch footprint."""
    G = 4 * HC
    need = 0
    need += 2 * T * b_tile * EC * 2                       # x block (bf16, 2 bufs)
    need += 2 * b_tile * 4                                 # lens block
    need += 2 * EC * G * 2                                 # wih (bf16)
    need += 2 * G * 4                                      # bias (f32)
    need += 2 * sum(hp * 4 * hp for hp in group_hp) * 2    # whh blocks (bf16)
    need += 2 * b_tile * T * HC * 4                        # out block (f32, 2 bufs)
    need += T * b_tile * G * 2                             # gx scratch (bf16)
    need = need * 5 // 4 + (4 << 20)                       # headroom
    # Cap at 64 MiB so the same config also fits v7x's smaller VMEM.
    return int(min(max(need, 16 << 20), 64 << 20))


def fused_charlm_lstm(x, lens2, wih_c, b_c, whh_list, *, b_tile, group_hp,
                      group_off, HC):
    """x: (T, Bp, EC) bf16 time-major fused embeddings -> (Bp, T, HC) f32."""
    T, Bp, EC = x.shape
    G = 4 * HC
    grid = (Bp // b_tile,)

    in_specs = [
        pl.BlockSpec((T, b_tile, EC), lambda i: (0, i, 0)),   # x
        pl.BlockSpec((b_tile, 1), lambda i: (i, 0)),          # lens
        # Weight blocks never change index -> they stay resident in VMEM.
        # (For production H~1024 they could be single-buffered as well.)
        pl.BlockSpec((EC, G), lambda i: (0, 0)),              # wih
        pl.BlockSpec((1, G), lambda i: (0, 0)),               # bias
    ] + [pl.BlockSpec((hg, 4 * hg), lambda i: (0, 0)) for hg in group_hp]

    kernel = _make_charlm_lstm_kernel(T, group_hp, group_off)

    return pl.pallas_call(
        kernel,
        out_shape=jax.ShapeDtypeStruct((Bp, T, HC), jnp.float32),
        grid_spec=pltpu.PrefetchScalarGridSpec(
            num_scalar_prefetch=0,
            grid=grid,
            in_specs=in_specs,
            out_specs=pl.BlockSpec((b_tile, T, HC), lambda i: (i, 0, 0)),
            scratch_shapes=[pltpu.VMEM((T, b_tile, G), jnp.bfloat16)],
        ),
        compiler_params=pltpu.CompilerParams(
            dimension_semantics=("parallel",),
            vmem_limit_bytes=_vmem_limit_bytes(T, b_tile, EC, HC, group_hp)),
    )(x, lens2, wih_c, b_c, *whh_list)


# ------------------------------------------------------------------ glue ----

def init_charlm_params(key, vocab, emb_dim, hidden_dim):
    # TODO(synk): real stanza charlm may be a multi-layer LSTM with dropout and
    # a projection; this synthetic charlm is a single-layer LSTM.
    k1, k2, k3, k4 = jax.random.split(key, 4)
    s = 0.1
    return dict(
        emb=(jax.random.normal(k1, (vocab, emb_dim), jnp.float32) * s),
        wih=(jax.random.normal(k2, (emb_dim, 4 * hidden_dim), jnp.float32) * s),
        whh=(jax.random.normal(k3, (hidden_dim, 4 * hidden_dim), jnp.float32) * s),
        b=(jax.random.normal(k4, (1, 4 * hidden_dim), jnp.float32) * s),
        hidden_dim=hidden_dim,
    )


def fuse_charlm_params(charlm_params_list):
    """Pack N charlms into lane-aligned groups with per-group recurrent blocks.

    Greedy grouping: a charlm joins the current group only if it fits in the
    lane padding that group has already paid for; otherwise it starts a new
    group.  Outcomes:
      * fwd/bwd charlms with H=1024  -> one group each, zero padding, two
        independent (H x 4H) recurrent dots (no zero-block MACs).
      * small charlms (H=32, 64)     -> one shared 128-lane group (tight
        packing, HC = 128 instead of 2*128).
    Weights are stored bf16 (MXU-native); accumulation in-kernel is f32.
    In production this packing would be done once at adapter init.
    """
    # TODO(synk): real stanza charlms each have their own char vocab; here all
    # charlms share the synthetic ord()%VOCAB_SIZE vocab so one gather suffices.
    n = len(charlm_params_list)
    embs = [np.asarray(p["emb"], np.float32) for p in charlm_params_list]
    vocab = embs[0].shape[0]
    assert all(e.shape[0] == vocab for e in embs)

    e_dims = [int(np.asarray(p["wih"]).shape[0]) for p in charlm_params_list]
    h_dims = [int(p["hidden_dim"]) for p in charlm_params_list]

    # --- greedy lane-aligned grouping ---
    groups = []
    cur, cur_sum = [], 0
    for i, H in enumerate(h_dims):
        if cur and _round_up(cur_sum + H, LANE) > _round_up(cur_sum, LANE):
            groups.append(cur)
            cur, cur_sum = [], 0
        cur.append(i)
        cur_sum += H
    groups.append(cur)

    group_hp = []       # padded lane width per group
    group_off = []      # hidden offset of each group in the fused concat
    feat_off = [0] * n  # per-charlm offset in the fused hidden concat
    off = 0
    for grp in groups:
        gsum = sum(h_dims[i] for i in grp)
        hp = _round_up(gsum, LANE)
        group_off.append(off)
        wo = 0
        for i in grp:
            feat_off[i] = off + wo
            wo += h_dims[i]
        group_hp.append(hp)
        off += hp
    HC = off
    G = 4 * HC

    e_off = np.concatenate([[0], np.cumsum(e_dims)]).astype(int)
    EC = int(e_off[-1])

    emb_c = np.zeros((vocab, EC), np.float32)
    wih_c = np.zeros((EC, G), np.float32)
    b_c = np.zeros((1, G), np.float32)
    whh_list = [np.zeros((hp, 4 * hp), np.float32) for hp in group_hp]

    for g, grp in enumerate(groups):
        hp = group_hp[g]
        go = group_off[g]
        wo = 0
        for i in grp:
            p = charlm_params_list[i]
            E, H = e_dims[i], h_dims[i]
            wih = np.asarray(p["wih"], np.float32)
            whh = np.asarray(p["whh"], np.float32)
            b = np.asarray(p["b"], np.float32).reshape(1, 4 * H)
            emb_c[:, e_off[i]:e_off[i] + E] = embs[i]
            for k in range(4):     # gate order i, f, g, o (PyTorch convention)
                col = 4 * go + k * hp + wo
                wih_c[e_off[i]:e_off[i] + E, col:col + H] = wih[:, k * H:(k + 1) * H]
                b_c[0, col:col + H] = b[0, k * H:(k + 1) * H]
                whh_list[g][wo:wo + H, k * hp + wo:k * hp + wo + H] = \
                    whh[:, k * H:(k + 1) * H]
            wo += H

    return dict(
        emb=jnp.asarray(emb_c),                         # f32 gather table
        wih=jnp.asarray(wih_c, dtype=jnp.bfloat16),
        b=jnp.asarray(b_c),                             # f32 bias
        whh=[jnp.asarray(w, dtype=jnp.bfloat16) for w in whh_list],
        group_hp=group_hp,
        group_off=group_off,
        feat_off=feat_off,
        hidden_dims=h_dims,
        EC=EC,
        HC=HC,
    )


def _encode_words(words, b_pad):
    """Add CHARLM_START/CHARLM_END, map chars to ids, pad to (b_pad, T_bucket)."""
    marked = [CHARLM_START + w + CHARLM_END for w in words]
    t_real = max(len(w) for w in marked)
    # Bucket T to a multiple of 8: bounds the number of distinct compiled
    # kernels and keeps the (b_tile, T, HC) output block sublane-aligned.
    T = max(_round_up(t_real, SUBLANE), SUBLANE)
    ids = np.full((b_pad, T), PAD_ID, dtype=np.int32)
    lens = np.zeros((b_pad,), dtype=np.int32)
    for i, w in enumerate(marked):
        lens[i] = len(w)
        for j, ch in enumerate(w):
            ids[i, j] = ord(ch) % VOCAB_SIZE
    return jnp.asarray(ids), jnp.asarray(lens), t_real


def _pick_b_tile(B, max_b_tile):
    """Choose the batch tile; prefer >=2 grid steps so the 'parallel' axis can
    shard across v7x's two TensorCores.  max_b_tile=128 fills the v5e MXU and
    fits v6e/v7x VMEM with bf16 weights/gx."""
    Bp = _round_up(max(B, 1), SUBLANE)
    if SUBLANE < Bp <= 2 * max_b_tile:
        b_tile = _round_up((Bp + 1) // 2, SUBLANE)
    else:
        b_tile = min(max_b_tile, Bp)
    Bp = _round_up(Bp, b_tile)
    return b_tile, Bp


def charlm_word_adapter_forward(words, charlm_params_list, *, max_b_tile=128):
    """Equivalent of CharacterLanguageModelWordAdapter.forward(words)."""
    fused = fuse_charlm_params(charlm_params_list)
    B = len(words)
    b_tile, Bp = _pick_b_tile(B, max_b_tile)

    ids, lens, t_real = _encode_words(words, Bp)       # (Bp, T), (Bp,)
    T = ids.shape[1]

    # Gather fused embeddings directly in time-major order (transpose the tiny
    # int32 ids, not the float activations) and feed the MXU bf16 inputs.
    ids_tm = ids.T                                     # (T, Bp)
    x = jnp.take(fused["emb"], ids_tm, axis=0).astype(jnp.bfloat16)

    out = fused_charlm_lstm(
        x, lens[:, None], fused["wih"], fused["b"], fused["whh"],
        b_tile=b_tile, group_hp=fused["group_hp"],
        group_off=fused["group_off"], HC=fused["HC"])  # (Bp, T, HC) batch-major

    out = out[:B, :t_real]                             # drop batch/time padding
    pieces = [out[:, :, off:off + h]
              for off, h in zip(fused["feat_off"], fused["hidden_dims"])]
    return jnp.concatenate(pieces, axis=-1)            # (B, T, sum(H))


# ------------------------------------------------------- pure-JAX reference --

def charlm_word_adapter_reference(words, charlm_params_list):
    marked = [CHARLM_START + w + CHARLM_END for w in words]
    B = len(marked)
    T = max(len(w) for w in marked)
    ids = np.full((B, T), PAD_ID, dtype=np.int32)
    lens = np.zeros((B,), dtype=np.int32)
    for i, w in enumerate(marked):
        lens[i] = len(w)
        for j, ch in enumerate(w):
            ids[i, j] = ord(ch) % VOCAB_SIZE
    ids = jnp.asarray(ids)
    lens = jnp.asarray(lens)

    reps = []
    for p in charlm_params_list:
        H = p["hidden_dim"]
        x = jnp.take(p["emb"], ids, axis=0)            # (B, T, E)
        h = jnp.zeros((B, H), jnp.float32)
        c = jnp.zeros((B, H), jnp.float32)
        rows = []
        for t in range(T):
            gates = x[:, t] @ p["wih"] + h @ p["whh"] + p["b"]
            i_g = jax.nn.sigmoid(gates[:, :H])
            f_g = jax.nn.sigmoid(gates[:, H:2 * H])
            g_g = jnp.tanh(gates[:, 2 * H:3 * H])
            o_g = jax.nn.sigmoid(gates[:, 3 * H:])
            c = f_g * c + i_g * g_g
            h = o_g * jnp.tanh(c)
            rows.append(h * (lens[:, None] > t).astype(jnp.float32))
        reps.append(jnp.stack(rows, axis=1))           # (B, T, H)
    return jnp.concatenate(reps, axis=-1)


if __name__ == "__main__":
    key = jax.random.PRNGKey(0)
    k1, k2 = jax.random.split(key)
    # Two charlms (e.g. forward & backward), hidden dims 32 and 64.
    charlms = [
        init_charlm_params(k1, VOCAB_SIZE, emb_dim=16, hidden_dim=32),
        init_charlm_params(k2, VOCAB_SIZE, emb_dim=16, hidden_dim=64),
    ]
    words = ["hello", "tpu", "pallas"]

    out = charlm_word_adapter_forward(words, charlms)
    out = jax.block_until_ready(out)

    # Expected: (num_words, max_len(with start/end markers), sum(hidden_dims))
    assert out.shape == (3, 8, 32 + 64), out.shape
    assert out.dtype == jnp.float32

    ref = charlm_word_adapter_reference(words, charlms)
    ref = jax.block_until_ready(ref)
    # bf16 weights / activations / gx scratch (f32 accumulation) -> tolerance
    # loosened vs the pure-f32 version.
    np.testing.assert_allclose(np.asarray(out), np.asarray(ref),
                               rtol=2e-2, atol=1e-2)

    print("KERNEL_OK")
</pallas_src>

<mosaic_0001>
module attributes {stable_mosaic.version = 11 : i64} {
  func.func @kernel(%arg0: i32, %arg1: memref<8x8x32xbf16, #tpu.memory_space<vmem>>, %arg2: memref<8x1xi32, #tpu.memory_space<vmem>>, %arg3: memref<32x512xbf16, #tpu.memory_space<vmem>>, %arg4: memref<1x512xf32, #tpu.memory_space<vmem>>, %arg5: memref<128x512xbf16, #tpu.memory_space<vmem>>, %arg6: memref<8x8x128xf32, #tpu.memory_space<vmem>>, %arg7: memref<8x8x512xbf16, #tpu.memory_space<vmem>>) attributes {dimension_semantics = [#tpu.dimension_semantics<parallel>], iteration_bounds = array<i64: 1>, scalar_prefetch = 0 : i64, scratch_operands = 1 : i64, tpu.core_type = #tpu.core_type<tc>, window_params = [{transform_indices = @transform_0, window_bounds = array<i64: 8, 8, 32>}, {transform_indices = @transform_1, window_bounds = array<i64: 8, 1>}, {pipeline_mode = #tpu.pipeline_mode<synchronous>, transform_indices = @transform_2, window_bounds = array<i64: 32, 512>}, {pipeline_mode = #tpu.pipeline_mode<synchronous>, transform_indices = @transform_3, window_bounds = array<i64: 1, 512>}, {pipeline_mode = #tpu.pipeline_mode<synchronous>, transform_indices = @transform_4, window_bounds = array<i64: 128, 512>}, {transform_indices = @transform_5, window_bounds = array<i64: 8, 8, 128>}]} {
    %c0 = arith.constant 0 : index
    %c0_0 = arith.constant 0 : index
    %c0_1 = arith.constant 0 : index
    %0 = vector.load %arg1[%c0, %c0_0, %c0_1] : memref<8x8x32xbf16, #tpu.memory_space<vmem>>, vector<8x8x32xbf16>
    %1 = vector.shape_cast %0 : vector<8x8x32xbf16> to vector<64x32xbf16>
    %c0_2 = arith.constant 0 : index
    %c0_3 = arith.constant 0 : index
    %2 = vector.load %arg3[%c0_2, %c0_3] : memref<32x512xbf16, #tpu.memory_space<vmem>>, vector<32x512xbf16>
    %cst = arith.constant dense<0.000000e+00> : vector<64x512xf32>
    %3 = tpu.matmul %1, %2, %cst {dimension_numbers = #tpu.dot_dimension_numbers<[1], [0], [0], [1], [0, 0, 1, 1], [], []>} : vector<64x32xbf16>, vector<32x512xbf16>, vector<64x512xf32> -> vector<64x512xf32>
    %c0_4 = arith.constant 0 : index
    %c0_5 = arith.constant 0 : index
    %4 = vector.load %arg4[%c0_4, %c0_5] : memref<1x512xf32, #tpu.memory_space<vmem>>, vector<1x512xf32>
    %5 = vector.broadcast %4 : vector<1x512xf32> to vector<64x512xf32>
    %6 = arith.addf %3, %5 : vector<64x512xf32>
    %7 = vector.shape_cast %6 : vector<64x512xf32> to vector<8x8x512xf32>
    %8 = arith.truncf %7 : vector<8x8x512xf32> to vector<8x8x512xbf16>
    %c0_6 = arith.constant 0 : index
    %c0_7 = arith.constant 0 : index
    %c0_8 = arith.constant 0 : index
    %9 = vector.load %arg7[%c0_6, %c0_7, %c0_8] : memref<8x8x512xbf16, #tpu.memory_space<vmem>>, vector<8x8x512xbf16>
    tpu.vector_store %arg7[%c0_6, %c0_7, %c0_8], %8 {strides = array<i32>} : memref<8x8x512xbf16, #tpu.memory_space<vmem>>, vector<8x8x512xbf16>,
    %c0_9 = arith.constant 0 : index
    %c0_10 = arith.constant 0 : index
    %10 = vector.load %arg2[%c0_9, %c0_10] : memref<8x1xi32, #tpu.memory_space<vmem>>, vector<8x1xi32>
    %c0_11 = arith.constant 0 : index
    %c0_12 = arith.constant 0 : index
    %11 = vector.load %arg5[%c0_11, %c0_12] : memref<128x512xbf16, #tpu.memory_space<vmem>>, vector<128x512xbf16>
    %cst_13 = arith.constant 0.000000e+00 : f32
    %12 = vector.broadcast %cst_13 : f32 to vector<8x128xf32>
    %cst_14 = arith.constant 0.000000e+00 : f32
    %13 = vector.broadcast %cst_14 : f32 to vector<8x128xf32>
    %c0_15 = arith.constant 0 : index
    %c0_16 = arith.constant 0 : index
    %c0_17 = arith.constant 0 : index
    %14 = vector.load %arg7[%c0_15, %c0_16, %c0_17] : memref<8x8x512xbf16, #tpu.memory_space<vmem>>, vector<1x8x512xbf16>
    %15 = vector.shape_cast %14 : vector<1x8x512xbf16> to vector<8x512xbf16>
    %c0_i32 = arith.constant 0 : i32
    %16 = vector.broadcast %c0_i32 : i32 to vector<8x1xi32>
    %17 = arith.cmpi sgt, %10, %16 : vector<8x1xi32>
    %18 = arith.extui %17 : vector<8x1xi1> to vector<8x1xi32>
    %19 = arith.sitofp %18 : vector<8x1xi32> to vector<8x1xf32>
    %20 = arith.truncf %12 : vector<8x128xf32> to vector<8x128xbf16>
    %cst_18 = arith.constant dense<0.000000e+00> : vector<8x512xf32>
    %21 = tpu.matmul %20, %11, %cst_18 {dimension_numbers = #tpu.dot_dimension_numbers<[1], [0], [0], [1], [0, 0, 1, 1], [], []>} : vector<8x128xbf16>, vector<128x512xbf16>, vector<8x512xf32> -> vector<8x512xf32>
    %22 = arith.extf %15 : vector<8x512xbf16> to vector<8x512xf32>
    %23 = arith.addf %22, %21 : vector<8x512xf32>
    %24 = vector.extract_strided_slice %23 {offsets = [0, 0], sizes = [8, 128], strides = [1, 1]} : vector<8x512xf32> to vector<8x128xf32>
    %25 = arith.negf %24 : vector<8x128xf32>
    %26 = math.exp %25 : vector<8x128xf32>
    %cst_19 = arith.constant 1.000000e+00 : f32
    %27 = vector.broadcast %cst_19 : f32 to vector<8x128xf32>
    %28 = arith.addf %27, %26 : vector<8x128xf32>
    %29 = arith.divf %27, %28 : vector<8x128xf32>
    %30 = vector.extract_strided_slice %23 {offsets = [0, 128], sizes = [8, 128], strides = [1, 1]} : vector<8x512xf32> to vector<8x128xf32>
    %31 = arith.negf %30 : vector<8x128xf32>
    %32 = math.exp %31 : vector<8x128xf32>
    %cst_20 = arith.constant 1.000000e+00 : f32
    %33 = vector.broadcast %cst_20 : f32 to vector<8x128xf32>
    %34 = arith.addf %33, %32 : vector<8x128xf32>
    %35 = arith.divf %33, %34 : vector<8x128xf32>
    %36 = vector.extract_strided_slice %23 {offsets = [0, 256], sizes = [8, 128], strides = [1, 1]} : vector<8x512xf32> to vector<8x128xf32>
    %37 = math.tanh %36 : vector<8x128xf32>
    %38 = vector.extract_strided_slice %23 {offsets = [0, 384], sizes = [8, 128], strides = [1, 1]} : vector<8x512xf32> to vector<8x128xf32>
    %39 = arith.negf %38 : vector<8x128xf32>
    %40 = math.exp %39 : vector<8x128xf32>
    %cst_21 = arith.constant 1.000000e+00 : f32
    %41 = vector.broadcast %cst_21 : f32 to vector<8x128xf32>
    %42 = arith.addf %41, %40 : vector<8x128xf32>
    %43 = arith.divf %41, %42 : vector<8x128xf32>
    %44 = arith.mulf %35, %13 : vector<8x128xf32>
    %45 = arith.mulf %29, %37 : vector<8x128xf32>
    %46 = arith.addf %44, %45 : vector<8x128xf32>
    %47 = math.tanh %46 : vector<8x128xf32>
    %48 = arith.mulf %43, %47 : vector<8x128xf32>
    %49 = vector.broadcast %19 : vector<8x1xf32> to vector<8x128xf32>
    %50 = arith.mulf %48, %49 : vector<8x128xf32>
    %51 = vector.shape_cast %50 : vector<8x128xf32> to vector<8x1x128xf32>
    %c0_22 = arith.constant 0 : index
    %c0_23 = arith.constant 0 : index
    %c0_24 = arith.constant 0 : index
    %52 = vector.load %arg6[%c0_22, %c0_23, %c0_24] : memref<8x8x128xf32, #tpu.memory_space<vmem>>, vector<8x1x128xf32>
    tpu.vector_store %arg6[%c0_22, %c0_23, %c0_24], %51 {strides = array<i32>} : memref<8x8x128xf32, #tpu.memory_space<vmem>>, vector<8x1x128xf32>,
    %c1 = arith.constant 1 : index
    %c0_25 = arith.constant 0 : index
    %c0_26 = arith.constant 0 : index
    %53 = vector.load %arg7[%c1, %c0_25, %c0_26] : memref<8x8x512xbf16, #tpu.memory_space<vmem>>, vector<1x8x512xbf16>
    %54 = vector.shape_cast %53 : vector<1x8x512xbf16> to vector<8x512xbf16>
    %c1_i32 = arith.constant 1 : i32
    %55 = vector.broadcast %c1_i32 : i32 to vector<8x1xi32>
    %56 = arith.cmpi sgt, %10, %55 : vector<8x1xi32>
    %57 = arith.extui %56 : vector<8x1xi1> to vector<8x1xi32>
    %58 = arith.sitofp %57 : vector<8x1xi32> to vector<8x1xf32>
    %59 = arith.truncf %48 : vector<8x128xf32> to vector<8x128xbf16>
    %cst_27 = arith.constant dense<0.000000e+00> : vector<8x512xf32>
    %60 = tpu.matmul %59, %11, %cst_27 {dimension_numbers = #tpu.dot_dimension_numbers<[1], [0], [0], [1], [0, 0, 1, 1], [], []>} : vector<8x128xbf16>, vector<128x512xbf16>, vector<8x512xf32> -> vector<8x512xf32>
    %61 = arith.extf %54 : vector<8x512xbf16> to vector<8x512xf32>
    %62 = arith.addf %61, %60 : vector<8x512xf32>
    %63 = vector.extract_strided_slice %62 {offsets = [0, 0], sizes = [8, 128], strides = [1, 1]} : vector<8x512xf32> to vector<8x128xf32>
    %64 = arith.negf %63 : vector<8x128xf32>
    %65 = math.exp %64 : vector<8x128xf32>
    %cst_28 = arith.constant 1.000000e+00 : f32
    %66 = vector.broadcast %cst_28 : f32 to vector<8x128xf32>
    %67 = arith.addf %66, %65 : vector<8x128xf32>
    %68 = arith.divf %66, %67 : vector<8x128xf32>
    %69 = vector.extract_strided_slice %62 {offsets = [0, 128], sizes = [8, 128], strides = [1, 1]} : vector<8x512xf32> to vector<8x128xf32>
    %70 = arith.negf %69 : vector<8x128xf32>
    %71 = math.exp %70 : vector<8x128xf32>
    %cst_29 = arith.constant 1.000000e+00 : f32
    %72 = vector.broadcast %cst_29 : f32 to vector<8x128xf32>
    %73 = arith.addf %72, %71 : vector<8x128xf32>
    %74 = arith.divf %72, %73 : vector<8x128xf32>
    %75 = vector.extract_strided_slice %62 {offsets = [0, 256], sizes = [8, 128], strides = [1, 1]} : vector<8x512xf32> to vector<8x128xf32>
    %76 = math.tanh %75 : vector<8x128xf32>
    %77 = vector.extract_strided_slice %62 {offsets = [0, 384], sizes = [8, 128], strides = [1, 1]} : vector<8x512xf32> to vector<8x128xf32>
    %78 = arith.negf %77 : vector<8x128xf32>
    %79 = math.exp %78 : vector<8x128xf32>
    %cst_30 = arith.constant 1.000000e+00 : f32
    %80 = vector.broadcast %cst_30 : f32 to vector<8x128xf32>
    %81 = arith.addf %80, %79 : vector<8x128xf32>
    %82 = arith.divf %80, %81 : vector<8x128xf32>
    %83 = arith.mulf %74, %46 : vector<8x128xf32>
    %84 = arith.mulf %68, %76 : vector<8x128xf32>
    %85 = arith.addf %83, %84 : vector<8x128xf32>
    %86 = math.tanh %85 : vector<8x128xf32>
    %87 = arith.mulf %82, %86 : vector<8x128xf32>
    %88 = vector.broadcast %58 : vector<8x1xf32> to vector<8x128xf32>
    %89 = arith.mulf %87, %88 : vector<8x128xf32>
    %90 = vector.shape_cast %89 : vector<8x128xf32> to vector<8x1x128xf32>
    %c0_31 = arith.constant 0 : index
    %c1_32 = arith.constant 1 : index
    %c0_33 = arith.constant 0 : index
    %91 = vector.load %arg6[%c0_31, %c1_32, %c0_33] : memref<8x8x128xf32, #tpu.memory_space<vmem>>, vector<8x1x128xf32>
    tpu.vector_store %arg6[%c0_31, %c1_32, %c0_33], %90 {strides = array<i32>} : memref<8x8x128xf32, #tpu.memory_space<vmem>>, vector<8x1x128xf32>,
    %c2 = arith.constant 2 : index
    %c0_34 = arith.constant 0 : index
    %c0_35 = arith.constant 0 : index
    %92 = vector.load %arg7[%c2, %c0_34, %c0_35] : memref<8x8x512xbf16, #tpu.memory_space<vmem>>, vector<1x8x512xbf16>
    %93 = vector.shape_cast %92 : vector<1x8x512xbf16> to vector<8x512xbf16>
    %c2_i32 = arith.constant 2 : i32
    %94 = vector.broadcast %c2_i32 : i32 to vector<8x1xi32>
    %95 = arith.cmpi sgt, %10, %94 : vector<8x1xi32>
    %96 = arith.extui %95 : vector<8x1xi1> to vector<8x1xi32>
    %97 = arith.sitofp %96 : vector<8x1xi32> to vector<8x1xf32>
    %98 = arith.truncf %87 : vector<8x128xf32> to vector<8x128xbf16>
    %cst_36 = arith.constant dense<0.000000e+00> : vector<8x512xf32>
    %99 = tpu.matmul %98, %11, %cst_36 {dimension_numbers = #tpu.dot_dimension_numbers<[1], [0], [0], [1], [0, 0, 1, 1], [], []>} : vector<8x128xbf16>, vector<128x512xbf16>, vector<8x512xf32> -> vector<8x512xf32>
    %100 = arith.extf %93 : vector<8x512xbf16> to vector<8x512xf32>
    %101 = arith.addf %100, %99 : vector<8x512xf32>
    %102 = vector.extract_strided_slice %101 {offsets = [0, 0], sizes = [8, 128], strides = [1, 1]} : vector<8x512xf32> to vector<8x128xf32>
    %103 = arith.negf %102 : vector<8x128xf32>
    %104 = math.exp %103 : vector<8x128xf32>
    %cst_37 = arith.constant 1.000000e+00 : f32
    %105 = vector.broadcast %cst_37 : f32 to vector<8x128xf32>
    %106 = arith.addf %105, %104 : vector<8x128xf32>
    %107 = arith.divf %105, %106 : vector<8x128xf32>
    %108 = vector.extract_strided_slice %101 {offsets = [0, 128], sizes = [8, 128], strides = [1, 1]} : vector<8x512xf32> to vector<8x128xf32>
    %109 = arith.negf %108 : vector<8x128xf32>
    %110 = math.exp %109 : vector<8x128xf32>
    %cst_38 = arith.constant 1.000000e+00 : f32
    %111 = vector.broadcast %cst_38 : f32 to vector<8x128xf32>
    %112 = arith.addf %111, %110 : vector<8x128xf32>
    %113 = arith.divf %111, %112 : vector<8x128xf32>
    %114 = vector.extract_strided_slice %101 {offsets = [0, 256], sizes = [8, 128], strides = [1, 1]} : vector<8x512xf32> to vector<8x128xf32>
    %115 = math.tanh %114 : vector<8x128xf32>
    %116 = vector.extract_strided_slice %101 {offsets = [0, 384], sizes = [8, 128], strides = [1, 1]} : vector<8x512xf32> to vector<8x128xf32>
    %117 = arith.negf %116 : vector<8x128xf32>
    %118 = math.exp %117 : vector<8x128xf32>
    %cst_39 = arith.constant 1.000000e+00 : f32
    %119 = vector.broadcast %cst_39 : f32 to vector<8x128xf32>
    %120 = arith.addf %119, %118 : vector<8x128xf32>
    %121 = arith.divf %119, %120 : vector<8x128xf32>
    %122 = arith.mulf %113, %85 : vector<8x128xf32>
    %123 = arith.mulf %107, %115 : vector<8x128xf32>
    %124 = arith.addf %122, %123 : vector<8x128xf32>
    %125 = math.tanh %124 : vector<8x128xf32>
    %126 = arith.mulf %121, %125 : vector<8x128xf32>
    %127 = vector.broadcast %97 : vector<8x1xf32> to vector<8x128xf32>
    %128 = arith.mulf %126, %127 : vector<8x128xf32>
    %129 = vector.shape_cast %128 : vector<8x128xf32> to vector<8x1x128xf32>
    %c0_40 = arith.constant 0 : index
    %c2_41 = arith.constant 2 : index
    %c0_42 = arith.constant 0 : index
    %130 = vector.load %arg6[%c0_40, %c2_41, %c0_42] : memref<8x8x128xf32, #tpu.memory_space<vmem>>, vector<8x1x128xf32>
    tpu.vector_store %arg6[%c0_40, %c2_41, %c0_42], %129 {strides = array<i32>} : memref<8x8x128xf32, #tpu.memory_space<vmem>>, vector<8x1x128xf32>,
    %c3 = arith.constant 3 : index
    %c0_43 = arith.constant 0 : index
    %c0_44 = arith.constant 0 : index
    %131 = vector.load %arg7[%c3, %c0_43, %c0_44] : memref<8x8x512xbf16, #tpu.memory_space<vmem>>, vector<1x8x512xbf16>
    %132 = vector.shape_cast %131 : vector<1x8x512xbf16> to vector<8x512xbf16>
    %c3_i32 = arith.constant 3 : i32
    %133 = vector.broadcast %c3_i32 : i32 to vector<8x1xi32>
    %134 = arith.cmpi sgt, %10, %133 : vector<8x1xi32>
    %135 = arith.extui %134 : vector<8x1xi1> to vector<8x1xi32>
    %136 = arith.sitofp %135 : vector<8x1xi32> to vector<8x1xf32>
    %137 = arith.truncf %126 : vector<8x128xf32> to vector<8x128xbf16>
    %cst_45 = arith.constant dense<0.000000e+00> : vector<8x512xf32>
    %138 = tpu.matmul %137, %11, %cst_45 {dimension_numbers = #tpu.dot_dimension_numbers<[1], [0], [0], [1], [0, 0, 1, 1], [], []>} : vector<8x128xbf16>, vector<128x512xbf16>, vector<8x512xf32> -> vector<8x512xf32>
    %139 = arith.extf %132 : vector<8x512xbf16> to vector<8x512xf32>
    %140 = arith.addf %139, %138 : vector<8x512xf32>
    %141 = vector.extract_strided_slice %140 {offsets = [0, 0], sizes = [8, 128], strides = [1, 1]} : vector<8x512xf32> to vector<8x128xf32>
    %142 = arith.negf %141 : vector<8x128xf32>
    %143 = math.exp %142 : vector<8x128xf32>
    %cst_46 = arith.constant 1.000000e+00 : f32
    %144 = vector.broadcast %cst_46 : f32 to vector<8x128xf32>
    %145 = arith.addf %144, %143 : vector<8x128xf32>
    %146 = arith.divf %144, %145 : vector<8x128xf32>
    %147 = vector.extract_strided_slice %140 {offsets = [0, 128], sizes = [8, 128], strides = [1, 1]} : vector<8x512xf32> to vector<8x128xf32>
    %148 = arith.negf %147 : vector<8x128xf32>
    %149 = math.exp %148 : vector<8x128xf32>
    %cst_47 = arith.constant 1.000000e+00 : f32
    %150 = vector.broadcast %cst_47 : f32 to vector<8x128xf32>
    %151 = arith.addf %150, %149 : vector<8x128xf32>
    %152 = arith.divf %150, %151 : vector<8x128xf32>
    %153 = vector.extract_strided_slice %140 {offsets = [0, 256], sizes = [8, 128], strides = [1, 1]} : vector<8x512xf32> to vector<8x128xf32>
    %154 = math.tanh %153 : vector<8x128xf32>
    %155 = vector.extract_strided_slice %140 {offsets = [0, 384], sizes = [8, 128], strides = [1, 1]} : vector<8x512xf32> to vector<8x128xf32>
    %156 = arith.negf %155 : vector<8x128xf32>
    %157 = math.exp %156 : vector<8x128xf32>
    %cst_48 = arith.constant 1.000000e+00 : f32
    %158 = vector.broadcast %cst_48 : f32 to vector<8x128xf32>
    %159 = arith.addf %158, %157 : vector<8x128xf32>
    %160 = arith.divf %158, %159 : vector<8x128xf32>
    %161 = arith.mulf %152, %124 : vector<8x128xf32>
    %162 = arith.mulf %146, %154 : vector<8x128xf32>
    %163 = arith.addf %161, %162 : vector<8x128xf32>
    %164 = math.tanh %163 : vector<8x128xf32>
    %165 = arith.mulf %160, %164 : vector<8x128xf32>
    %166 = vector.broadcast %136 : vector<8x1xf32> to vector<8x128xf32>
    %167 = arith.mulf %165, %166 : vector<8x128xf32>
    %168 = vector.shape_cast %167 : vector<8x128xf32> to vector<8x1x128xf32>
    %c0_49 = arith.constant 0 : index
    %c3_50 = arith.constant 3 : index
    %c0_51 = arith.constant 0 : index
    %169 = vector.load %arg6[%c0_49, %c3_50, %c0_51] : memref<8x8x128xf32, #tpu.memory_space<vmem>>, vector<8x1x128xf32>
    tpu.vector_store %arg6[%c0_49, %c3_50, %c0_51], %168 {strides = array<i32>} : memref<8x8x128xf32, #tpu.memory_space<vmem>>, vector<8x1x128xf32>,
    %c4 = arith.constant 4 : index
    %c0_52 = arith.constant 0 : index
    %c0_53 = arith.constant 0 : index
    %170 = vector.load %arg7[%c4, %c0_52, %c0_53] : memref<8x8x512xbf16, #tpu.memory_space<vmem>>, vector<1x8x512xbf16>
    %171 = vector.shape_cast %170 : vector<1x8x512xbf16> to vector<8x512xbf16>
    %c4_i32 = arith.constant 4 : i32
    %172 = vector.broadcast %c4_i32 : i32 to vector<8x1xi32>
    %173 = arith.cmpi sgt, %10, %172 : vector<8x1xi32>
    %174 = arith.extui %173 : vector<8x1xi1> to vector<8x1xi32>
    %175 = arith.sitofp %174 : vector<8x1xi32> to vector<8x1xf32>
    %176 = arith.truncf %165 : vector<8x128xf32> to vector<8x128xbf16>
    %cst_54 = arith.constant dense<0.000000e+00> : vector<8x512xf32>
    %177 = tpu.matmul %176, %11, %cst_54 {dimension_numbers = #tpu.dot_dimension_numbers<[1], [0], [0], [1], [0, 0, 1, 1], [], []>} : vector<8x128xbf16>, vector<128x512xbf16>, vector<8x512xf32> -> vector<8x512xf32>
    %178 = arith.extf %171 : vector<8x512xbf16> to vector<8x512xf32>
    %179 = arith.addf %178, %177 : vector<8x512xf32>
    %180 = vector.extract_strided_slice %179 {offsets = [0, 0], sizes = [8, 128], strides = [1, 1]} : vector<8x512xf32> to vector<8x128xf32>
    %181 = arith.negf %180 : vector<8x128xf32>
    %182 = math.exp %181 : vector<8x128xf32>
    %cst_55 = arith.constant 1.000000e+00 : f32
    %183 = vector.broadcast %cst_55 : f32 to vector<8x128xf32>
    %184 = arith.addf %183, %182 : vector<8x128xf32>
    %185 = arith.divf %183, %184 : vector<8x128xf32>
    %186 = vector.extract_strided_slice %179 {offsets = [0, 128], sizes = [8, 128], strides = [1, 1]} : vector<8x512xf32> to vector<8x128xf32>
    %187 = arith.negf %186 : vector<8x128xf32>
    %188 = math.exp %187 : vector<8x128xf32>
    %cst_56 = arith.constant 1.000000e+00 : f32
    %189 = vector.broadcast %cst_56 : f32 to vector<8x128xf32>
    %190 = arith.addf %189, %188 : vector<8x128xf32>
    %191 = arith.divf %189, %190 : vector<8x128xf32>
    %192 = vector.extract_strided_slice %179 {offsets = [0, 256], sizes = [8, 128], strides = [1, 1]} : vector<8x512xf32> to vector<8x128xf32>
    %193 = math.tanh %192 : vector<8x128xf32>
    %194 = vector.extract_strided_slice %179 {offsets = [0, 384], sizes = [8, 128], strides = [1, 1]} : vector<8x512xf32> to vector<8x128xf32>
    %195 = arith.negf %194 : vector<8x128xf32>
    %196 = math.exp %195 : vector<8x128xf32>
    %cst_57 = arith.constant 1.000000e+00 : f32
    %197 = vector.broadcast %cst_57 : f32 to vector<8x128xf32>
    %198 = arith.addf %197, %196 : vector<8x128xf32>
    %199 = arith.divf %197, %198 : vector<8x128xf32>
    %200 = arith.mulf %191, %163 : vector<8x128xf32>
    %201 = arith.mulf %185, %193 : vector<8x128xf32>
    %202 = arith.addf %200, %201 : vector<8x128xf32>
    %203 = math.tanh %202 : vector<8x128xf32>
    %204 = arith.mulf %199, %203 : vector<8x128xf32>
    %205 = vector.broadcast %175 : vector<8x1xf32> to vector<8x128xf32>
    %206 = arith.mulf %204, %205 : vector<8x128xf32>
    %207 = vector.shape_cast %206 : vector<8x128xf32> to vector<8x1x128xf32>
    %c0_58 = arith.constant 0 : index
    %c4_59 = arith.constant 4 : index
    %c0_60 = arith.constant 0 : index
    %208 = vector.load %arg6[%c0_58, %c4_59, %c0_60] : memref<8x8x128xf32, #tpu.memory_space<vmem>>, vector<8x1x128xf32>
    tpu.vector_store %arg6[%c0_58, %c4_59, %c0_60], %207 {strides = array<i32>} : memref<8x8x128xf32, #tpu.memory_space<vmem>>, vector<8x1x128xf32>,
    %c5 = arith.constant 5 : index
    %c0_61 = arith.constant 0 : index
    %c0_62 = arith.constant 0 : index
    %209 = vector.load %arg7[%c5, %c0_61, %c0_62] : memref<8x8x512xbf16, #tpu.memory_space<vmem>>, vector<1x8x512xbf16>
    %210 = vector.shape_cast %209 : vector<1x8x512xbf16> to vector<8x512xbf16>
    %c5_i32 = arith.constant 5 : i32
    %211 = vector.broadcast %c5_i32 : i32 to vector<8x1xi32>
    %212 = arith.cmpi sgt, %10, %211 : vector<8x1xi32>
    %213 = arith.extui %212 : vector<8x1xi1> to vector<8x1xi32>
    %214 = arith.sitofp %213 : vector<8x1xi32> to vector<8x1xf32>
    %215 = arith.truncf %204 : vector<8x128xf32> to vector<8x128xbf16>
    %cst_63 = arith.constant dense<0.000000e+00> : vector<8x512xf32>
    %216 = tpu.matmul %215, %11, %cst_63 {dimension_numbers = #tpu.dot_dimension_numbers<[1], [0], [0], [1], [0, 0, 1, 1], [], []>} : vector<8x128xbf16>, vector<128x512xbf16>, vector<8x512xf32> -> vector<8x512xf32>
    %217 = arith.extf %210 : vector<8x512xbf16> to vector<8x512xf32>
    %218 = arith.addf %217, %216 : vector<8x512xf32>
    %219 = vector.extract_strided_slice %218 {offsets = [0, 0], sizes = [8, 128], strides = [1, 1]} : vector<8x512xf32> to vector<8x128xf32>
    %220 = arith.negf %219 : vector<8x128xf32>
    %221 = math.exp %220 : vector<8x128xf32>
    %cst_64 = arith.constant 1.000000e+00 : f32
    %222 = vector.broadcast %cst_64 : f32 to vector<8x128xf32>
    %223 = arith.addf %222, %221 : vector<8x128xf32>
    %224 = arith.divf %222, %223 : vector<8x128xf32>
    %225 = vector.extract_strided_slice %218 {offsets = [0, 128], sizes = [8, 128], strides = [1, 1]} : vector<8x512xf32> to vector<8x128xf32>
    %226 = arith.negf %225 : vector<8x128xf32>
    %227 = math.exp %226 : vector<8x128xf32>
    %cst_65 = arith.constant 1.000000e+00 : f32
    %228 = vector.broadcast %cst_65 : f32 to vector<8x128xf32>
    %229 = arith.addf %228, %227 : vector<8x128xf32>
    %230 = arith.divf %228, %229 : vector<8x128xf32>
    %231 = vector.extract_strided_slice %218 {offsets = [0, 256], sizes = [8, 128], strides = [1, 1]} : vector<8x512xf32> to vector<8x128xf32>
    %232 = math.tanh %231 : vector<8x128xf32>
    %233 = vector.extract_strided_slice %218 {offsets = [0, 384], sizes = [8, 128], strides = [1, 1]} : vector<8x512xf32> to vector<8x128xf32>
    %234 = arith.negf %233 : vector<8x128xf32>
    %235 = math.exp %234 : vector<8x128xf32>
    %cst_66 = arith.constant 1.000000e+00 : f32
    %236 = vector.broadcast %cst_66 : f32 to vector<8x128xf32>
    %237 = arith.addf %236, %235 : vector<8x128xf32>
    %238 = arith.divf %236, %237 : vector<8x128xf32>
    %239 = arith.mulf %230, %202 : vector<8x128xf32>
    %240 = arith.mulf %224, %232 : vector<8x128xf32>
    %241 = arith.addf %239, %240 : vector<8x128xf32>
    %242 = math.tanh %241 : vector<8x128xf32>
    %243 = arith.mulf %238, %242 : vector<8x128xf32>
    %244 = vector.broadcast %214 : vector<8x1xf32> to vector<8x128xf32>
    %245 = arith.mulf %243, %244 : vector<8x128xf32>
    %246 = vector.shape_cast %245 : vector<8x128xf32> to vector<8x1x128xf32>
    %c0_67 = arith.constant 0 : index
    %c5_68 = arith.constant 5 : index
    %c0_69 = arith.constant 0 : index
    %247 = vector.load %arg6[%c0_67, %c5_68, %c0_69] : memref<8x8x128xf32, #tpu.memory_space<vmem>>, vector<8x1x128xf32>
    tpu.vector_store %arg6[%c0_67, %c5_68, %c0_69], %246 {strides = array<i32>} : memref<8x8x128xf32, #tpu.memory_space<vmem>>, vector<8x1x128xf32>,
    %c6 = arith.constant 6 : index
    %c0_70 = arith.constant 0 : index
    %c0_71 = arith.constant 0 : index
    %248 = vector.load %arg7[%c6, %c0_70, %c0_71] : memref<8x8x512xbf16, #tpu.memory_space<vmem>>, vector<1x8x512xbf16>
    %249 = vector.shape_cast %248 : vector<1x8x512xbf16> to vector<8x512xbf16>
    %c6_i32 = arith.constant 6 : i32
    %250 = vector.broadcast %c6_i32 : i32 to vector<8x1xi32>
    %251 = arith.cmpi sgt, %10, %250 : vector<8x1xi32>
    %252 = arith.extui %251 : vector<8x1xi1> to vector<8x1xi32>
    %253 = arith.sitofp %252 : vector<8x1xi32> to vector<8x1xf32>
    %254 = arith.truncf %243 : vector<8x128xf32> to vector<8x128xbf16>
    %cst_72 = arith.constant dense<0.000000e+00> : vector<8x512xf32>
    %255 = tpu.matmul %254, %11, %cst_72 {dimension_numbers = #tpu.dot_dimension_numbers<[1], [0], [0], [1], [0, 0, 1, 1], [], []>} : vector<8x128xbf16>, vector<128x512xbf16>, vector<8x512xf32> -> vector<8x512xf32>
    %256 = arith.extf %249 : vector<8x512xbf16> to vector<8x512xf32>
    %257 = arith.addf %256, %255 : vector<8x512xf32>
    %258 = vector.extract_strided_slice %257 {offsets = [0, 0], sizes = [8, 128], strides = [1, 1]} : vector<8x512xf32> to vector<8x128xf32>
    %259 = arith.negf %258 : vector<8x128xf32>
    %260 = math.exp %259 : vector<8x128xf32>
    %cst_73 = arith.constant 1.000000e+00 : f32
    %261 = vector.broadcast %cst_73 : f32 to vector<8x128xf32>
    %262 = arith.addf %261, %260 : vector<8x128xf32>
    %263 = arith.divf %261, %262 : vector<8x128xf32>
    %264 = vector.extract_strided_slice %257 {offsets = [0, 128], sizes = [8, 128], strides = [1, 1]} : vector<8x512xf32> to vector<8x128xf32>
    %265 = arith.negf %264 : vector<8x128xf32>
    %266 = math.exp %265 : vector<8x128xf32>
    %cst_74 = arith.constant 1.000000e+00 : f32
    %267 = vector.broadcast %cst_74 : f32 to vector<8x128xf32>
    %268 = arith.addf %267, %266 : vector<8x128xf32>
    %269 = arith.divf %267, %268 : vector<8x128xf32>
    %270 = vector.extract_strided_slice %257 {offsets = [0, 256], sizes = [8, 128], strides = [1, 1]} : vector<8x512xf32> to vector<8x128xf32>
    %271 = math.tanh %270 : vector<8x128xf32>
    %272 = vector.extract_strided_slice %257 {offsets = [0, 384], sizes = [8, 128], strides = [1, 1]} : vector<8x512xf32> to vector<8x128xf32>
    %273 = arith.negf %272 : vector<8x128xf32>
    %274 = math.exp %273 : vector<8x128xf32>
    %cst_75 = arith.constant 1.000000e+00 : f32
    %275 = vector.broadcast %cst_75 : f32 to vector<8x128xf32>
    %276 = arith.addf %275, %274 : vector<8x128xf32>
    %277 = arith.divf %275, %276 : vector<8x128xf32>
    %278 = arith.mulf %269, %241 : vector<8x128xf32>
    %279 = arith.mulf %263, %271 : vector<8x128xf32>
    %280 = arith.addf %278, %279 : vector<8x128xf32>
    %281 = math.tanh %280 : vector<8x128xf32>
    %282 = arith.mulf %277, %281 : vector<8x128xf32>
    %283 = vector.broadcast %253 : vector<8x1xf32> to vector<8x128xf32>
    %284 = arith.mulf %282, %283 : vector<8x128xf32>
    %285 = vector.shape_cast %284 : vector<8x128xf32> to vector<8x1x128xf32>
    %c0_76 = arith.constant 0 : index
    %c6_77 = arith.constant 6 : index
    %c0_78 = arith.constant 0 : index
    %286 = vector.load %arg6[%c0_76, %c6_77, %c0_78] : memref<8x8x128xf32, #tpu.memory_space<vmem>>, vector<8x1x128xf32>
    tpu.vector_store %arg6[%c0_76, %c6_77, %c0_78], %285 {strides = array<i32>} : memref<8x8x128xf32, #tpu.memory_space<vmem>>, vector<8x1x128xf32>,
    %c7 = arith.constant 7 : index
    %c0_79 = arith.constant 0 : index
    %c0_80 = arith.constant 0 : index
    %287 = vector.load %arg7[%c7, %c0_79, %c0_80] : memref<8x8x512xbf16, #tpu.memory_space<vmem>>, vector<1x8x512xbf16>
    %288 = vector.shape_cast %287 : vector<1x8x512xbf16> to vector<8x512xbf16>
    %c7_i32 = arith.constant 7 : i32
    %289 = vector.broadcast %c7_i32 : i32 to vector<8x1xi32>
    %290 = arith.cmpi sgt, %10, %289 : vector<8x1xi32>
    %291 = arith.extui %290 : vector<8x1xi1> to vector<8x1xi32>
    %292 = arith.sitofp %291 : vector<8x1xi32> to vector<8x1xf32>
    %293 = arith.truncf %282 : vector<8x128xf32> to vector<8x128xbf16>
    %cst_81 = arith.constant dense<0.000000e+00> : vector<8x512xf32>
    %294 = tpu.matmul %293, %11, %cst_81 {dimension_numbers = #tpu.dot_dimension_numbers<[1], [0], [0], [1], [0, 0, 1, 1], [], []>} : vector<8x128xbf16>, vector<128x512xbf16>, vector<8x512xf32> -> vector<8x512xf32>
    %295 = arith.extf %288 : vector<8x512xbf16> to vector<8x512xf32>
    %296 = arith.addf %295, %294 : vector<8x512xf32>
    %297 = vector.extract_strided_slice %296 {offsets = [0, 0], sizes = [8, 128], strides = [1, 1]} : vector<8x512xf32> to vector<8x128xf32>
    %298 = arith.negf %297 : vector<8x128xf32>
    %299 = math.exp %298 : vector<8x128xf32>
    %cst_82 = arith.constant 1.000000e+00 : f32
    %300 = vector.broadcast %cst_82 : f32 to vector<8x128xf32>
    %301 = arith.addf %300, %299 : vector<8x128xf32>
    %302 = arith.divf %300, %301 : vector<8x128xf32>
    %303 = vector.extract_strided_slice %296 {offsets = [0, 128], sizes = [8, 128], strides = [1, 1]} : vector<8x512xf32> to vector<8x128xf32>
    %304 = arith.negf %303 : vector<8x128xf32>
    %305 = math.exp %304 : vector<8x128xf32>
    %cst_83 = arith.constant 1.000000e+00 : f32
    %306 = vector.broadcast %cst_83 : f32 to vector<8x128xf32>
    %307 = arith.addf %306, %305 : vector<8x128xf32>
    %308 = arith.divf %306, %307 : vector<8x128xf32>
    %309 = vector.extract_strided_slice %296 {offsets = [0, 256], sizes = [8, 128], strides = [1, 1]} : vector<8x512xf32> to vector<8x128xf32>
    %310 = math.tanh %309 : vector<8x128xf32>
    %311 = vector.extract_strided_slice %296 {offsets = [0, 384], sizes = [8, 128], strides = [1, 1]} : vector<8x512xf32> to vector<8x128xf32>
    %312 = arith.negf %311 : vector<8x128xf32>
    %313 = math.exp %312 : vector<8x128xf32>
    %cst_84 = arith.constant 1.000000e+00 : f32
    %314 = vector.broadcast %cst_84 : f32 to vector<8x128xf32>
    %315 = arith.addf %314, %313 : vector<8x128xf32>
    %316 = arith.divf %314, %315 : vector<8x128xf32>
    %317 = arith.mulf %308, %280 : vector<8x128xf32>
    %318 = arith.mulf %302, %310 : vector<8x128xf32>
    %319 = arith.addf %317, %318 : vector<8x128xf32>
    %320 = math.tanh %319 : vector<8x128xf32>
    %321 = arith.mulf %316, %320 : vector<8x128xf32>
    %322 = vector.broadcast %292 : vector<8x1xf32> to vector<8x128xf32>
    %323 = arith.mulf %321, %322 : vector<8x128xf32>
    %324 = vector.shape_cast %323 : vector<8x128xf32> to vector<8x1x128xf32>
    %c0_85 = arith.constant 0 : index
    %c7_86 = arith.constant 7 : index
    %c0_87 = arith.constant 0 : index
    %325 = vector.load %arg6[%c0_85, %c7_86, %c0_87] : memref<8x8x128xf32, #tpu.memory_space<vmem>>, vector<8x1x128xf32>
    tpu.vector_store %arg6[%c0_85, %c7_86, %c0_87], %324 {strides = array<i32>} : memref<8x8x128xf32, #tpu.memory_space<vmem>>, vector<8x1x128xf32>,
    return
  }
  func.func @transform_0(%arg0: i32) -> (i32, i32, i32) {
    %c0_i32 = arith.constant 0 : i32
    %c0_i32_0 = arith.constant 0 : i32
    %c0_i32_1 = arith.constant 0 : i32
    return %c0_i32, %arg0, %c0_i32_0 : i32, i32, i32
  }
  func.func @transform_1(%arg0: i32) -> (i32, i32) {
    %c0_i32 = arith.constant 0 : i32
    %c0_i32_0 = arith.constant 0 : i32
    return %arg0, %c0_i32 : i32, i32
  }
  func.func @transform_2(%arg0: i32) -> (i32, i32) {
    %c0_i32 = arith.constant 0 : i32
    %c0_i32_0 = arith.constant 0 : i32
    %c0_i32_1 = arith.constant 0 : i32
    return %c0_i32, %c0_i32_0 : i32, i32
  }
  func.func @transform_3(%arg0: i32) -> (i32, i32) {
    %c0_i32 = arith.constant 0 : i32
    %c0_i32_0 = arith.constant 0 : i32
    %c0_i32_1 = arith.constant 0 : i32
    return %c0_i32, %c0_i32_0 : i32, i32
  }
  func.func @transform_4(%arg0: i32) -> (i32, i32) {
    %c0_i32 = arith.constant 0 : i32
    %c0_i32_0 = arith.constant 0 : i32
    %c0_i32_1 = arith.constant 0 : i32
    return %c0_i32, %c0_i32_0 : i32, i32
  }
  func.func @transform_5(%arg0: i32) -> (i32, i32, i32) {
    %c0_i32 = arith.constant 0 : i32
    %c0_i32_0 = arith.constant 0 : i32
    %c0_i32_1 = arith.constant 0 : i32
    return %arg0, %c0_i32, %c0_i32_0 : i32, i32, i32
  }
}

</mosaic_0001>

<bundles_post_ra>
// kernel: tpu_custom_call.1
= control target key start
LH: loop header
LB: loop body
LE: loop exit
PB: predicated region body
PF: predicated region fallthrough
CT: control target
= control target key end

     0   :  { %10 = vsyncpa [#allocation4], 0  ;;  %s3414_s0 = inlined_call_operand.hbm [shape: bf16[8,8,32], index: 0, kind: input, shape index: {}]   ;;  %s3415_s1 = inlined_call_operand.vmem [shape: s32[8,1], index: 1, kind: input, shape index: {}]   ;;  %s3416_s2 = inlined_call_operand.hbm [shape: bf16[32,512], index: 2, kind: input, shape index: {}]   ;;  %s3417_s3 = inlined_call_operand.vmem [shape: f32[1,512], index: 3, kind: input, shape index: {}]   ;;  %s3418_s4 = inlined_call_operand.hbm [shape: bf16[128,512], index: 4, kind: input, shape index: {}]   ;;  %s3419_s5 = inlined_call_operand.hbm [shape: f32[8,8,128], index: 5, kind: output, shape index: {}]  }
   0x1   :  { %11 = vsyncpa [#allocation7], 0 }
   0x2   :  { %12 = vsyncpa [#allocation5], 0  ;;  %s2711_s18 = smov [#allocation6]  }
   0x3   :  { %s32_s19 = sshll.u32 %s2711_s18, 4  ;;  %s33_s19 = int_to_ptr.vmem [resolvable:$true] %s32_s19 }
   0x4   :  { %s2633_s20 = scalar_lea.vmem %s33_s19, 1024  ;;  %p2638_p1 = scmp.lt.s32.totalorder %s33_s19, %s33_s19 }
   0x5   :  { %p2634_p0 = scmp.ne.s32.totalorder %s33_s19, %s2633_s20  ;;  %p2639_p2 = scmp.lt.s32.totalorder %s2633_s20, %s2633_s20 }
   0x7   :  { %p2640_p3 = por %p2639_p2, %p2638_p1 }
   0x9   :  { %p2641_p4 = pnand %p2640_p3, %p2634_p0 }
   0xb   :  { %2644 = shalt.err (!%p2641_p4)
}
   0xc   :  { %s2712_s21 = smov 256   ;;  %s2713_s22 = smov 16  }
   0xd   :  { %38 = dma.hbm_to_vmem [thread:$0]  %s3416_s2, 1024, %s33_s19, [#allocation7], %s2712_s21, %s2712_s21, %s2713_s22  }
   0xe   :  { %s2714_s25 = smov [#allocation3]  }
   0xf   :  { %s18_s26 = sshll.u32 %s2714_s25, 4  ;;  %s19_s26 = int_to_ptr.vmem [resolvable:$true] %s18_s26 }
  0x10   :  { %s2653_s27 = scalar_lea.vmem %s19_s26, 512  ;;  %p2658_p6 = scmp.lt.s32.totalorder %s19_s26, %s19_s26 }
  0x11   :  { %p2654_p5 = scmp.ne.s32.totalorder %s19_s26, %s2653_s27  ;;  %p2659_p7 = scmp.lt.s32.totalorder %s2653_s27, %s2653_s27 }
  0x13   :  { %p2660_p8 = por %p2659_p7, %p2658_p6 }
  0x15   :  { %p2661_p9 = pnand %p2660_p8, %p2654_p5 }
  0x17   :  { %2664 = shalt.err (!%p2661_p9)
}
  0x18   :  { %s2715_s28 = smov 64   ;;  %s2716_s29 = smov 4  }
  0x19   :  { %24 = dma.hbm_to_vmem [thread:$0]  %s3414_s0, 512, %s19_s26, [#allocation4], %s2715_s28, %s2715_s28, %s2716_s29  }
  0x1a   :  { %s2717_s7 = smov [#allocation8]  }
  0x1b   :  { %s46_s8 = sshll.u32 %s2717_s7, 4  ;;  %s47_s8 = int_to_ptr.vmem [resolvable:$true] %s46_s8 }
  0x1c   :  { %s2673_s2 = scalar_lea.vmem %s47_s8, 4096  ;;  %p2678_p11 = scmp.lt.s32.totalorder %s47_s8, %s47_s8 }
  0x1d   :  { %p2674_p10 = scmp.ne.s32.totalorder %s47_s8, %s2673_s2  ;;  %p2679_p12 = scmp.lt.s32.totalorder %s2673_s2, %s2673_s2 }
  0x1f   :  { %p2680_p13 = por %p2679_p12, %p2678_p11 }
  0x21   :  { %p2681_p0 = pnand %p2680_p13, %p2674_p10 }
  0x23   :  { %2684 = shalt.err (!%p2681_p0)
}
  0x24   :  { %52 = dma.hbm_to_vmem [thread:$0]  %s3418_s4, 4096, %s47_s8, [#allocation7], %s2712_s21, %s2712_s21, %s2713_s22  }
  0x25   :  { %2705 = dma.done.wait [#allocation4], 512  }
  0x26   :  { %2706 = vsyncadd [#allocation4], 4294966784 }
  0x27   :  { %2707 = dma.done.wait [#allocation7], 5120  }
  0x28   :  { %2708 = vsyncadd [#allocation7], 4294962176  ;;  %v3422_v0 = vmov 0   ;;  %v2400_v1 = vld [vmem:[#allocation6 + $0x24] ss:$16 sps:$4 sm:$0xff]   ;;  %vm161_vm0 = vcmask 261120   ;;  %v81_v50 = vlaneseq }
  0x29   :  { %206 = vmatprep.mubr.bf16.mxu0 %v3422_v0  ;;  %279 = vmatprep.mubr.bf16.mxu1 %v3422_v0  ;;  %v2402_v2 = vld [vmem:[#allocation6 + $0x2c] ss:$16 sps:$4 sm:$0xff]   ;;  %v2404_v3 = vld [vmem:[#allocation6 + $0x20] ss:$16 sps:$4 sm:$0xff]   ;;  %v2405_v4 = vld [vmem:[#allocation6 + $0x28] ss:$16 sps:$4 sm:$0xff]  }
  0x2a   :  { %2378 = vset.pattern.permute.xlu0 %v3422_v0  ;;  %2389 = vset.pattern.permute.xlu1 %v3422_v0  ;;  %v2406_v5 = vld [vmem:[#allocation6 + $0x4] ss:$16 sps:$4 sm:$0xff]   ;;  %v2408_v6 = vld [vmem:[#allocation6 + $0xc] ss:$16 sps:$4 sm:$0xff]   ;;  %v2410_v7 = vld [vmem:[#allocation6] ss:$16 sps:$4 sm:$0xff]  }
  0x2b   :  { %186 = vmatprep.subr.bf16.mxu0 %v2400_v1  ;;  %259 = vmatprep.subr.bf16.mxu1 %v2402_v2  ;;  %v2411_v8 = vld [vmem:[#allocation6 + $0x8] ss:$16 sps:$4 sm:$0xff]   ;;  %v2412_v9 = vld [vmem:[#allocation3] sm:$0xff]   ;;  %v2769_v11 = vld [vmem:[#allocation8 + $0xec] ss:$16 sps:$4 sm:$0xff]   ;;  %v3420_v42 = vmov 0.0  }
  0x2c   :  { %187 = vmatpush1.bf16.msra.mxu0 %v2404_v3  ;;  %260 = vmatpush1.bf16.msra.mxu1 %v2405_v4  ;;  %v2767_v10 = vld [vmem:[#allocation8 + $0xe4] ss:$16 sps:$4 sm:$0xff]   ;;  %v2771_v12 = vld [vmem:[#allocation8 + $0xe0] ss:$16 sps:$4 sm:$0xff]   ;;  %v2773_v13 = vld [vmem:[#allocation8 + $0xe8] ss:$16 sps:$4 sm:$0xff]  }
  0x2d   :  { %188 = vmatprep.subr.bf16.mxu0 %v2406_v5  ;;  %261 = vmatprep.subr.bf16.mxu1 %v2408_v6  ;;  %v2776_v14 = vld [vmem:[#allocation8 + $0xc4] ss:$16 sps:$4 sm:$0xff]   ;;  %v2779_v15 = vld [vmem:[#allocation8 + $0xcc] ss:$16 sps:$4 sm:$0xff]   ;;  %v2783_v16 = vld [vmem:[#allocation8 + $0xc0] ss:$16 sps:$4 sm:$0xff]  }
  0x2e   :  { %v2787_v17 = vld [vmem:[#allocation8 + $0xc8] ss:$16 sps:$4 sm:$0xff]   ;;  %v2791_v18 = vld [vmem:[#allocation8 + $0xa4] ss:$16 sps:$4 sm:$0xff]   ;;  %v2795_v20 = vld [vmem:[#allocation8 + $0xac] ss:$16 sps:$4 sm:$0xff]  }
  0x2f   :  { %v2425_v19 = vld [vmem:[#allocation3 + $0x8] sm:$0xff]   ;;  %v2797_v21 = vld [vmem:[#allocation8 + $0xa0] ss:$16 sps:$4 sm:$0xff]   ;;  %v2805_v23 = vld [vmem:[#allocation8 + $0x84] ss:$16 sps:$4 sm:$0xff]   ;;  %v2926_v51 = vshrl.u32 %v81_v50, 7 }
  0x30   :  { %189 = vmatpush1.bf16.msra.mxu0 %v2410_v7  ;;  %262 = vmatpush1.bf16.msra.mxu1 %v2411_v8  ;;  %v2801_v22 = vld [vmem:[#allocation8 + $0xa8] ss:$16 sps:$4 sm:$0xff]   ;;  %v2807_v24 = vld [vmem:[#allocation8 + $0x8c] ss:$16 sps:$4 sm:$0xff]   ;;  %v2811_v25 = vld [vmem:[#allocation8 + $0x80] ss:$16 sps:$4 sm:$0xff]  }
  0x31   :  { %662 = vmatprep.subr.bf16.mxu0 %v2767_v10  ;;  %703 = vmatprep.subr.bf16.mxu1 %v2769_v11  ;;  %v2815_v26 = vld [vmem:[#allocation8 + $0x88] ss:$16 sps:$4 sm:$0xff]   ;;  %v2819_v27 = vld [vmem:[#allocation8 + $0x64] ss:$16 sps:$4 sm:$0xff]   ;;  %v2821_v28 = vld [vmem:[#allocation8 + $0x6c] ss:$16 sps:$4 sm:$0xff]  }
  0x32   :  { %v2438_v29 = vld [vmem:[#allocation3 + $0x10] sm:$0xff]   ;;  %v2827_v31 = vld [vmem:[#allocation8 + $0x68] ss:$16 sps:$4 sm:$0xff]   ;;  %v2835_v33 = vld [vmem:[#allocation8 + $0x4c] ss:$16 sps:$4 sm:$0xff]   ;;  %v91_v52 = vsub.s32 2, %v2926_v51 }
  0x33   :  { %2229 = vmatmul.mubr.msk.bf16.vlgmr.msra.gmra.mxu0 %vm161_vm0, %v2412_v9  ;;  %2233 = vmatmul.mubr.msk.bf16.vlgmr.msra.gmra.mxu1 %vm161_vm0, %v2412_v9  ;;  %v2825_v30 = vld [vmem:[#allocation8 + $0x60] ss:$16 sps:$4 sm:$0xff]   ;;  %v2831_v32 = vld [vmem:[#allocation8 + $0x44] ss:$16 sps:$4 sm:$0xff]   ;;  %v2841_v35 = vld [vmem:[#allocation8 + $0x48] ss:$16 sps:$4 sm:$0xff]  }
  0x34   :  { %663 = vmatpush1.bf16.msra.mxu0 %v2771_v12  ;;  %704 = vmatpush1.bf16.msra.mxu1 %v2773_v13  ;;  %v2839_v34 = vld [vmem:[#allocation8 + $0x40] ss:$16 sps:$4 sm:$0xff]   ;;  %v2845_v36 = vld [vmem:[#allocation8 + $0x24] ss:$16 sps:$4 sm:$0xff]   ;;  %v2849_v37 = vld [vmem:[#allocation8 + $0x2c] ss:$16 sps:$4 sm:$0xff]  }
  0x35   :  { %664 = vmatprep.subr.bf16.mxu0 %v2776_v14  ;;  %705 = vmatprep.subr.bf16.mxu1 %v2779_v15  ;;  %v2856_v38 = vld [vmem:[%s3415_s1] sm:$0xff]  ;;  %v2451_v39 = vld [vmem:[#allocation3 + $0x18] sm:$0xff]   ;;  %v83_v53 = vsub.s32 0, %v2926_v51  ;;  %v95_v54 = vsub.s32 3, %v2926_v51  ;;  %v87_v59 = vsub.s32 1, %v2926_v51 }
  0x36   :  { %216 = vmatprep.mubr.bf16.mxu0 %v3422_v0  ;;  %289 = vmatprep.mubr.bf16.mxu1 %v3422_v0  ;;  %vm499_vm1 = vcmp.gt.s32.totalorder %v2856_v38, 0  ;;  %vm851_vm2 = vcmp.gt.s32.totalorder %v2856_v38, 1  ;;  %v2862_v40 = vld [vmem:[#allocation8 + $0x20] ss:$16 sps:$4 sm:$0xff]   ;;  %v2864_v41 = vld [vmem:[#allocation8 + $0x28] ss:$16 sps:$4 sm:$0xff]  }
  0x37   :  { %v2253_v43 = vsel %vm499_vm1, 1.0, %v3420_v42  ;;  %v2293_v44 = vsel %vm851_vm2, 1.0, %v3420_v42  ;;  %v2870_v45 = vld [vmem:[#allocation8 + $0x4] ss:$16 sps:$4 sm:$0xff]   ;;  %v2872_v46 = vld [vmem:[#allocation8 + $0xc] ss:$16 sps:$4 sm:$0xff]  }
  0x38   :  { %665 = vmatpush1.bf16.msra.mxu0 %v2783_v16  ;;  %706 = vmatpush1.bf16.msra.mxu1 %v2787_v17  ;;  %v2379_v47 = vpack.i.bf16 %v2293_v44, %v2253_v43  ;;  %v2878_v48 = vld [vmem:[#allocation8] ss:$16 sps:$4 sm:$0xff]   ;;  %v2880_v49 = vld [vmem:[#allocation8 + $0x8] ss:$16 sps:$4 sm:$0xff]   ;;  %vm1044_vm3 = vcmp.gt.s32.totalorder %v2856_v38, 2  ;;  %vm1237_vm4 = vcmp.gt.s32.totalorder %v2856_v38, 3 }
  0x39   :  { %666 = vmatprep.subr.bf16.mxu0 %v2791_v18  ;;  %707 = vmatprep.subr.bf16.mxu1 %v2795_v20  ;;  %v79_v55 = vld [vmem:[%s3417_s3] sm:$0xf]  ;;  %vm1430_vm5 = vcmp.gt.s32.totalorder %v2856_v38, 4  ;;  %vm1623_vm6 = vcmp.gt.s32.totalorder %v2856_v38, 5 }
  0x3a   :  { %2380 = vperm.xlu0 %2378, %v2379_v47   ;;  %v2936_v58 = vrot.slane %v79_v55, %v91_v52  ;;  %v2941_v62 = vrot.slane %v79_v55, %v83_v53  ;;  %v2943_v63 = vrot.slane %v79_v55, %v95_v54  ;;  %v2945_v3 = vrot.slane %v79_v55, %v87_v59 }
  0x3b   :  { %2230 = vmatmul.mubr.msk.bf16.gmra.mxu0 %vm161_vm0, %v2425_v19  ;;  %2234 = vmatmul.mubr.msk.bf16.gmra.mxu1 %vm161_vm0, %v2425_v19 }
  0x3c   :  { %667 = vmatpush1.bf16.msra.mxu0 %v2797_v21  ;;  %708 = vmatpush1.bf16.msra.mxu1 %v2801_v22 }
  0x3d   :  { %668 = vmatprep.subr.bf16.mxu0 %v2805_v23  ;;  %709 = vmatprep.subr.bf16.mxu1 %v2807_v24 }
  0x3e   :  { %226 = vmatprep.mubr.bf16.mxu0 %v3422_v0  ;;  %299 = vmatprep.mubr.bf16.mxu1 %v3422_v0 }
  0x40   :  { %669 = vmatpush1.bf16.msra.mxu0 %v2811_v25  ;;  %710 = vmatpush1.bf16.msra.mxu1 %v2815_v26 }
  0x41   :  { %670 = vmatprep.subr.bf16.mxu0 %v2819_v27  ;;  %711 = vmatprep.subr.bf16.mxu1 %v2821_v28 }
  0x43   :  { %2231 = vmatmul.mubr.msk.bf16.gmra.mxu0 %vm161_vm0, %v2438_v29  ;;  %2235 = vmatmul.mubr.msk.bf16.gmra.mxu1 %vm161_vm0, %v2438_v29 }
  0x44   :  { %671 = vmatpush1.bf16.msra.mxu0 %v2825_v30  ;;  %712 = vmatpush1.bf16.msra.mxu1 %v2827_v31 }
  0x45   :  { %672 = vmatprep.subr.bf16.mxu0 %v2831_v32  ;;  %713 = vmatprep.subr.bf16.mxu1 %v2835_v33 }
  0x46   :  { %236 = vmatprep.mubr.bf16.mxu0 %v3422_v0  ;;  %309 = vmatprep.mubr.bf16.mxu1 %v3422_v0 }
  0x48   :  { %673 = vmatpush1.bf16.msra.mxu0 %v2839_v34  ;;  %714 = vmatpush1.bf16.msra.mxu1 %v2841_v35 }
  0x49   :  { %674 = vmatprep.subr.bf16.mxu0 %v2845_v36  ;;  %715 = vmatprep.subr.bf16.mxu1 %v2849_v37 }
  0x4b   :  { %2232 = vmatmul.mubr.msk.bf16.gmra.mxu0 %vm161_vm0, %v2451_v39  ;;  %2236 = vmatmul.mubr.msk.bf16.gmra.mxu1 %vm161_vm0, %v2451_v39 }
  0x4c   :  { %675 = vmatpush1.bf16.msra.mxu0 %v2862_v40  ;;  %716 = vmatpush1.bf16.msra.mxu1 %v2864_v41 }
  0x4d   :  { %676 = vmatprep.subr.bf16.mxu0 %v2870_v45  ;;  %717 = vmatprep.subr.bf16.mxu1 %v2872_v46 }
  0x4e   :  { %694 = vmatprep.mubr.bf16.mxu0 %v3422_v0  ;;  %735 = vmatprep.mubr.bf16.mxu1 %v3422_v0 }
  0x50   :  { %677 = vmatpush1.bf16.msra.mxu0 %v2878_v48  ;;  %718 = vmatpush1.bf16.msra.mxu1 %v2880_v49 }
  0x51   :  { %855 = vmatprep.subr.bf16.mxu0 %v2767_v10  ;;  %896 = vmatprep.subr.bf16.mxu1 %v2769_v11 }
  0x53   :  { %695 = vmatmul.mubr.bf16.vlgmr.msra.gmra.mxu0 %v3422_v0  ;;  %736 = vmatmul.mubr.bf16.vlgmr.msra.gmra.mxu1 %v3422_v0 }
  0x54   :  { %856 = vmatpush1.bf16.msra.mxu0 %v2771_v12  ;;  %897 = vmatpush1.bf16.msra.mxu1 %v2773_v13 }
  0x55   :  { %857 = vmatprep.subr.bf16.mxu0 %v2776_v14  ;;  %898 = vmatprep.subr.bf16.mxu1 %v2779_v15 }
  0x56   :  { %887 = vmatprep.mubr.bf16.mxu0 %v3422_v0  ;;  %928 = vmatprep.mubr.bf16.mxu1 %v3422_v0 }
  0x58   :  { %858 = vmatpush1.bf16.msra.mxu0 %v2783_v16  ;;  %899 = vmatpush1.bf16.msra.mxu1 %v2787_v17 }
  0x59   :  { %859 = vmatprep.subr.bf16.mxu0 %v2791_v18  ;;  %900 = vmatprep.subr.bf16.mxu1 %v2795_v20 }
  0x5c   :  { %860 = vmatpush1.bf16.msra.mxu0 %v2797_v21  ;;  %901 = vmatpush1.bf16.msra.mxu1 %v2801_v22 }
  0x5d   :  { %861 = vmatprep.subr.bf16.mxu0 %v2805_v23  ;;  %902 = vmatprep.subr.bf16.mxu1 %v2807_v24 }
  0x60   :  { %862 = vmatpush1.bf16.msra.mxu0 %v2811_v25  ;;  %903 = vmatpush1.bf16.msra.mxu1 %v2815_v26 }
  0x61   :  { %863 = vmatprep.subr.bf16.mxu0 %v2819_v27  ;;  %904 = vmatprep.subr.bf16.mxu1 %v2821_v28 }
  0x64   :  { %864 = vmatpush1.bf16.msra.mxu0 %v2825_v30  ;;  %905 = vmatpush1.bf16.msra.mxu1 %v2827_v31 }
  0x65   :  { %865 = vmatprep.subr.bf16.mxu0 %v2831_v32  ;;  %906 = vmatprep.subr.bf16.mxu1 %v2835_v33 }
  0x68   :  { %866 = vmatpush1.bf16.msra.mxu0 %v2839_v34  ;;  %907 = vmatpush1.bf16.msra.mxu1 %v2841_v35 }
  0x69   :  { %867 = vmatprep.subr.bf16.mxu0 %v2845_v36  ;;  %908 = vmatprep.subr.bf16.mxu1 %v2849_v37 }
  0x6c   :  { %868 = vmatpush1.bf16.msra.mxu0 %v2862_v40  ;;  %909 = vmatpush1.bf16.msra.mxu1 %v2864_v41 }
  0x6d   :  { %869 = vmatprep.subr.bf16.mxu0 %v2870_v45  ;;  %910 = vmatprep.subr.bf16.mxu1 %v2872_v46 }
  0x70   :  { %870 = vmatpush1.bf16.msra.mxu0 %v2878_v48  ;;  %911 = vmatpush1.bf16.msra.mxu1 %v2880_v49 }
  0x71   :  { %1048 = vmatprep.subr.bf16.mxu0 %v2767_v10  ;;  %1089 = vmatprep.subr.bf16.mxu1 %v2769_v11 }
  0xf3   :  { %v208_v56 = vpop.f32.mrf.mxu0  ;;  %v2934_v57 = vpop.f32.mrf.mxu1 }
  0xf5   :  { %v210_v60 = vpop.f32.mrf.mxu0  ;;  %v2939_v61 = vpop.f32.mrf.mxu1 }
  0xf7   :  { %v212_v1 = vpop.f32.mrf.mxu0  ;;  %v285_v2 = vpop.f32.mrf.mxu1 }
  0xf8   :  { %v213_v4 = vadd.f32 %v212_v1, %v2941_v62  ;;  %v286_v5 = vadd.f32 %v285_v2, %v2936_v58 }
  0xf9   :  { %v214_v6 = vpop.f32.mrf.mxu0  ;;  %v287_v7 = vpop.f32.mrf.mxu1 }
  0xfa   :  { %v215_v8 = vadd.f32 %v214_v6, %v2945_v3  ;;  %v288_v9 = vadd.f32 %v287_v7, %v2943_v63 }
  0xfb   :  { %v218_v19 = vpop.f32.mrf.mxu0  ;;  %v291_v29 = vpop.f32.mrf.mxu1 }
  0xfc   :  { %v2951_v39 = vpack.c.bf16 %v215_v8, %v213_v4  ;;  %v2953_v43 = vpack.c.bf16 %v288_v9, %v286_v5  ;;  %v219_v44 = vadd.f32 %v218_v19, %v2941_v62  ;;  %v292_v47 = vadd.f32 %v291_v29, %v2936_v58 }
  0xfd   :  { %v220_v50 = vpop.f32.mrf.mxu0  ;;  %v293_v52 = vpop.f32.mrf.mxu1 }
  0xfe   :  { %v221_v53 = vadd.f32 %v220_v50, %v2945_v3  ;;  %v294_v54 = vadd.f32 %v293_v52, %v2943_v63 }
  0xff   :  { %v222_v55 = vpop.f32.mrf.mxu0  ;;  %v295_v59 = vpop.f32.mrf.mxu1 }
 0x100   :  { %v2959_v1 = vpack.c.bf16 %v221_v53, %v219_v44  ;;  %v2961_v2 = vpack.c.bf16 %v294_v54, %v292_v47  ;;  %v223_v4 = vadd.f32 %v222_v55, %v2941_v62  ;;  %v296_v5 = vadd.f32 %v295_v59, %v2936_v58 }
 0x101   :  { %v224_v6 = vpop.f32.mrf.mxu0  ;;  %v297_v7 = vpop.f32.mrf.mxu1 }
 0x102   :  { %3432 = vst [vmem:[#allocation13_spill] sm:$0xff] %v2961_v2  ;;  %v225_v8 = vadd.f32 %v224_v6, %v2945_v3  ;;  %v298_v9 = vadd.f32 %v297_v7, %v2943_v63 }
 0x103   :  { %v228_v19 = vpop.f32.mrf.mxu0  ;;  %v301_v29 = vpop.f32.mrf.mxu1 }
 0x104   :  { %v2967_v50 = vpack.c.bf16 %v225_v8, %v223_v4  ;;  %v2969_v52 = vpack.c.bf16 %v298_v9, %v296_v5  ;;  %v229_v44 = vadd.f32 %v228_v19, %v2941_v62  ;;  %v302_v47 = vadd.f32 %v301_v29, %v2936_v58 }
 0x105   :  { %v230_v53 = vpop.f32.mrf.mxu0  ;;  %v303_v54 = vpop.f32.mrf.mxu1  ;;  %v211_v19 = vadd.f32 %v210_v60, %v2945_v3 }
 0x106   :  { %3433 = vst [vmem:[#allocation14_spill] sm:$0xff] %v2967_v50  ;;  %3434 = vst [vmem:[#allocation15_spill] sm:$0xff] %v2969_v52  ;;  %v231_v55 = vadd.f32 %v230_v53, %v2945_v3  ;;  %v304_v59 = vadd.f32 %v303_v54, %v2943_v63  ;;  %v209_v54 = vadd.f32 %v208_v56, %v2941_v62 }
 0x107   :  { %v232_v42 = vpop.f32.mrf.mxu0  ;;  %v305_v6 = vpop.f32.mrf.mxu1 }
 0x108   :  { %v2975_v0 = vpack.c.bf16 %v231_v55, %v229_v44  ;;  %v2977_v7 = vpack.c.bf16 %v304_v59, %v302_v47  ;;  %v233_v4 = vadd.f32 %v232_v42, %v2941_v62  ;;  %v306_v5 = vadd.f32 %v305_v6, %v2936_v58 }
 0x109   :  { %v234_v8 = vpop.f32.mrf.mxu0  ;;  %v307_v9 = vpop.f32.mrf.mxu1 }
 0x10a   :  { %3435 = vst [vmem:[#allocation16_spill] sm:$0xff] %v2975_v0  ;;  %3436 = vst [vmem:[#allocation17_spill] sm:$0xff] %v2977_v7  ;;  %v235_v29 = vadd.f32 %v234_v8, %v2945_v3  ;;  %v308_v53 = vadd.f32 %v307_v9, %v2943_v63  ;;  %v2349_v7 = vpack.c.bf16 %v211_v19, %v209_v54 }
 0x10b   :  { %v238_v52 = vpop.f32.mrf.mxu0  ;;  %v311_v50 = vpop.f32.mrf.mxu1 }
 0x10c   :  { %v2985_v44 = vpack.c.bf16 %v235_v29, %v233_v4  ;;  %v2987_v47 = vpack.c.bf16 %v308_v53, %v306_v5  ;;  %v239_v42 = vadd.f32 %v238_v52, %v2941_v62  ;;  %v312_v55 = vadd.f32 %v311_v50, %v2936_v58 }
 0x10d   :  { %v240_v59 = vpop.f32.mrf.mxu0  ;;  %v313_v6 = vpop.f32.mrf.mxu1  ;;  %v744_v53 = vunpack.c.l.bf16 %v2349_v7 }
 0x10e   :  { %3437 = vst [vmem:[#allocation18_spill] sm:$0xff] %v2987_v47  ;;  %v241_v60 = vadd.f32 %v240_v59, %v2945_v3  ;;  %v314_v8 = vadd.f32 %v313_v6, %v2943_v63 }
 0x10f   :  { %v242_v9 = vpop.f32.mrf.mxu0  ;;  %v315_v0 = vpop.f32.mrf.mxu1 }
 0x110   :  { %v2993_v56 = vpack.c.bf16 %v241_v60, %v239_v42  ;;  %v2995_v2 = vpack.c.bf16 %v314_v8, %v312_v55  ;;  %v243_v4 = vadd.f32 %v242_v9, %v2941_v62  ;;  %v316_v5 = vadd.f32 %v315_v0, %v2936_v58 }
 0x111   :  { %v244_v52 = vpop.f32.mrf.mxu0  ;;  %v317_v29 = vpop.f32.mrf.mxu1  ;;  %v745_v55 = vunpack.c.h.bf16 %v2349_v7  ;;  %v282_v62 = vadd.f32 %v2934_v57, %v2936_v58  ;;  %v284_v0 = vadd.f32 %v2939_v61, %v2943_v63 }
 0x112   :  { %3438 = vst [vmem:[#allocation19_spill] sm:$0xff] %v2995_v2  ;;  %v245_v50 = vadd.f32 %v244_v52, %v2945_v3  ;;  %v318_v19 = vadd.f32 %v317_v29, %v2943_v63 }
 0x113   :  { %v696_v54 = vpop.f32.mrf.mxu0  ;;  %v737_v59 = vpop.f32.mrf.mxu1 }
 0x114   :  { %v3001_v6 = vpack.c.bf16 %v245_v50, %v243_v4  ;;  %v3003_v47 = vpack.c.bf16 %v318_v19, %v316_v5  ;;  %v748_v42 = vadd.f32 %v744_v53, %v696_v54  ;;  %v2350_v4 = vpack.c.bf16 %v284_v0, %v282_v62 }
 0x115   :  { %v698_v60 = vpop.f32.mrf.mxu0  ;;  %v739_v8 = vpop.f32.mrf.mxu1 }
 0x116   :  { %3439 = vst [vmem:[#allocation20_spill] sm:$0xff] %v3003_v47  ;;  %v2286_v3 = vmul.f32 -1.442695, %v748_v42  ;;  %v749_v9 = vadd.f32 %v745_v55, %v698_v60  ;;  %v747_v19 = vunpack.c.h.bf16 %v2350_v4  ;;  %v746_v53 = vunpack.c.l.bf16 %v2350_v4 }
 0x117   :  { %v700_v52 = vpop.f32.mrf.mxu0  ;;  %v741_v29 = vpop.f32.mrf.mxu1 }
 0x118   :  { %2464 = vpow2.f32 %v2286_v3  ;;  %v2287_v2 = vmul.f32 -1.442695, %v749_v9  ;;  %v751_v7 = vadd.f32 %v747_v19, %v739_v8  ;;  %v750_v58 = vadd.f32 %v746_v53, %v737_v59  ;;  %v3012_v52 = vpop.permute.xlu0 %2380 }
 0x119   :  { %v701_v50 = vpop.f32.mrf.mxu0  ;;  %v742_v5 = vpop.f32.mrf.mxu1  ;;  %v2720_v59 = vmov 1966171168   ;;  %v2382_v4 = vunpack.i.l.bf16 %v3012_v52 }
 0x11a   :  { %2466 = vpow2.f32 %v2287_v2  ;;  %v2288_v54 = vmul.f32 -1.442695, %v751_v7  ;;  %v785_v8 = vunpack.c.l.s4 %v2720_v59 }
 0x11c   :  { %2468 = vpow2.f32 %v2288_v54 }
 0x125   :  { %v2465_v57 = vpop.eup %2464 }
 0x126   :  { %v755_v47 = vadd.f32 1.0, %v2465_v57 }
 0x127   :  { %v2467_v61 = vpop.eup %2466 }
 0x128   :  { %2470 = vrcp.f32 %v755_v47  ;;  %v761_v63 = vadd.f32 1.0, %v2467_v61  ;;  %v786_v47 = vunpack.c.0.s8 %v785_v8  ;;  %v3441_v8 = vmov 0.0  }
 0x129   :  { %2472 = vtanh.f32 %v750_v58  ;;  %v2469_v42 = vpop.eup %2468 }
 0x12a   :  { %2474 = vrcp.f32 %v761_v63  ;;  %v768_v0 = vadd.f32 1.0, %v2469_v42  ;;  %v3016_v5 = vsub.s32 %v786_v47, %v2926_v51  ;;  %v3440_v51 = vmov 0  }
 0x12b   :  { %v2301_v47 = vsel %vm1044_vm3, 1.0, %v3441_v8 }
 0x12c   :  { %2476 = vrcp.f32 %v768_v0 }
 0x135   :  { %v2471_v55 = vpop.eup %2470 }
 0x136   :  { %v2473_v60 = vpop.eup %2472 }
 0x137   :  { %v2475_v62 = vpop.eup %2474  ;;  %v772_v2 = vmul.f32 %v2473_v60, %v2471_v55 }
 0x138   :  { %v771_v3 = vmul.f32 0.0, %v2475_v62 }
 0x139   :  { %v2477_v29 = vpop.eup %2476 }
 0x13a   :  { %v3009_v9 = vadd.f32 %v772_v2, %v771_v3 }
 0x13c   :  { %2478 = vtanh.f32 %v3009_v9 }
 0x149   :  { %v2479_v50 = vpop.eup %2478 }
 0x14a   :  { %v775_v19 = vmul.f32 %v2479_v50, %v2477_v29  ;;  %v2309_v29 = vsel %vm1237_vm4, 1.0, %v3441_v8  ;;  %v937_v50 = vunpack.c.l.bf16 %v2951_v39 }
 0x14c   :  { %v781_v7 = vmul.f32 %v2382_v4, %v775_v19  ;;  %v854_v53 = vpack.c.bf16 %v775_v19, %v775_v19  ;;  %v2384_v4 = vpack.i.bf16 %v2309_v29, %v2301_v47 }
 0x14e   :  { %v783_v54 = vcombine.high %v781_v7, %v781_v7  ;;  %v790_v57 = vrot.slane %v781_v7, %v3016_v5  ;;  %888 = vmatmul.mubr.bf16.vlgmr.msra.gmra.mxu0 %v854_v53  ;;  %929 = vmatmul.mubr.bf16.vlgmr.msra.gmra.mxu1 %v854_v53 }
 0x14f   :  { %1049 = vmatpush1.bf16.msra.mxu0 %v2771_v12  ;;  %1090 = vmatpush1.bf16.msra.mxu1 %v2773_v13 }
 0x150   :  { %v797_v58 = vrot.slane %v783_v54, %v3016_v5  ;;  %v798_v61 = vcombine.high %v790_v57, %v790_v57  ;;  %v806_v63 = vrot.slane %v790_v57, %v3016_v5  ;;  %2289 = vst.sshfl [vmem:[#allocation9] sm:$0x1 pattern:$0x73625140] %v790_v57  ;;  %1050 = vmatprep.subr.bf16.mxu0 %v2776_v14  ;;  %v938_v54 = vunpack.c.h.bf16 %v2951_v39 }
 0x151   :  { %1091 = vmatprep.subr.bf16.mxu1 %v2779_v15  ;;  %1080 = vmatprep.mubr.bf16.mxu0 %v3440_v51 }
 0x152   :  { %1121 = vmatprep.mubr.bf16.mxu1 %v3440_v51  ;;  %v799_v42 = vcombine.high %v797_v58, %v797_v58  ;;  %v813_v55 = vrot.slane %v797_v58, %v3016_v5  ;;  %v820_v60 = vrot.slane %v798_v61, %v3016_v5  ;;  %v828_v62 = vcombine.high %v806_v63, %v806_v63 }
 0x153   :  { %2290 = vst.sshfl [vmem:[#allocation9 + $0x8] sm:$0x1 pattern:$0x73625140] %v798_v61  ;;  %1051 = vmatpush1.bf16.msra.mxu0 %v2783_v16  ;;  %1092 = vmatpush1.bf16.msra.mxu1 %v2787_v17 }
 0x154   :  { %2291 = vst.sshfl [vmem:[#allocation9 + $0x20] sm:$0x1 pattern:$0x73625140] %v797_v58  ;;  %v827_v0 = vrot.slane %v799_v42, %v3016_v5  ;;  %v829_v3 = vcombine.high %v813_v55, %v813_v55  ;;  %v830_v2 = vcombine.high %v820_v60, %v820_v60  ;;  %842 = vst [vmem:[#allocation9 + $0x10] sm:$0x1] %v828_v62  ;;  %1052 = vmatprep.subr.bf16.mxu0 %v2791_v18 }
 0x155   :  { %2292 = vst.sshfl [vmem:[#allocation9 + $0x28] sm:$0x1 pattern:$0x73625140] %v799_v42  ;;  %1093 = vmatprep.subr.bf16.mxu1 %v2795_v20  ;;  %2385 = vperm.xlu0 %2378, %v2384_v4  }
 0x156   :  { %v831_v59 = vcombine.high %v827_v0, %v827_v0  ;;  %843 = vst [vmem:[#allocation9 + $0x18] sm:$0x1] %v830_v2  ;;  %846 = vst [vmem:[#allocation9 + $0x30] sm:$0x1] %v829_v3  ;;  %v940_v3 = vunpack.c.h.bf16 %v2953_v43 }
 0x157   :  { %1053 = vmatpush1.bf16.msra.mxu0 %v2797_v21  ;;  %1094 = vmatpush1.bf16.msra.mxu1 %v2801_v22 }
 0x158   :  { %847 = vst [vmem:[#allocation9 + $0x38] sm:$0x1] %v831_v59  ;;  %1054 = vmatprep.subr.bf16.mxu0 %v2805_v23  ;;  %1095 = vmatprep.subr.bf16.mxu1 %v2807_v24  ;;  %v939_v59 = vunpack.c.l.bf16 %v2953_v43 }
 0x15b   :  { %1055 = vmatpush1.bf16.msra.mxu0 %v2811_v25  ;;  %1096 = vmatpush1.bf16.msra.mxu1 %v2815_v26 }
 0x15c   :  { %1056 = vmatprep.subr.bf16.mxu0 %v2819_v27  ;;  %1097 = vmatprep.subr.bf16.mxu1 %v2821_v28 }
 0x15f   :  { %1057 = vmatpush1.bf16.msra.mxu0 %v2825_v30  ;;  %1098 = vmatpush1.bf16.msra.mxu1 %v2827_v31 }
 0x160   :  { %1058 = vmatprep.subr.bf16.mxu0 %v2831_v32  ;;  %1099 = vmatprep.subr.bf16.mxu1 %v2835_v33 }
 0x163   :  { %1059 = vmatpush1.bf16.msra.mxu0 %v2839_v34  ;;  %1100 = vmatpush1.bf16.msra.mxu1 %v2841_v35 }
 0x164   :  { %1060 = vmatprep.subr.bf16.mxu0 %v2845_v36  ;;  %1101 = vmatprep.subr.bf16.mxu1 %v2849_v37 }
 0x167   :  { %1061 = vmatpush1.bf16.msra.mxu0 %v2862_v40  ;;  %1102 = vmatpush1.bf16.msra.mxu1 %v2864_v41 }
 0x168   :  { %1062 = vmatprep.subr.bf16.mxu0 %v2870_v45  ;;  %1103 = vmatprep.subr.bf16.mxu1 %v2872_v46 }
 0x16b   :  { %1063 = vmatpush1.bf16.msra.mxu0 %v2878_v48  ;;  %1104 = vmatpush1.bf16.msra.mxu1 %v2880_v49 }
 0x16c   :  { %1241 = vmatprep.subr.bf16.mxu0 %v2767_v10  ;;  %1282 = vmatprep.subr.bf16.mxu1 %v2769_v11 }
 0x20e   :  { %v889_v19 = vpop.f32.mrf.mxu0  ;;  %v930_v7 = vpop.f32.mrf.mxu1 }
 0x20f   :  { %v941_v53 = vadd.f32 %v937_v50, %v889_v19  ;;  %v943_v47 = vadd.f32 %v939_v59, %v930_v7  ;;  %v2383_v7 = vunpack.i.h.bf16 %v3012_v52 }
 0x210   :  { %v891_v57 = vpop.f32.mrf.mxu0  ;;  %v932_v58 = vpop.f32.mrf.mxu1 }
 0x211   :  { %v2294_v61 = vmul.f32 -1.442695, %v941_v53  ;;  %v942_v63 = vadd.f32 %v938_v54, %v891_v57  ;;  %v944_v2 = vadd.f32 %v940_v3, %v932_v58 }
 0x212   :  { %v893_v42 = vpop.f32.mrf.mxu0  ;;  %v934_v55 = vpop.f32.mrf.mxu1 }
 0x213   :  { %2480 = vpow2.f32 %v2294_v61  ;;  %v2295_v60 = vmul.f32 -1.442695, %v942_v63  ;;  %v2296_v29 = vmul.f32 -1.442695, %v944_v2 }
 0x214   :  { %v894_v62 = vpop.f32.mrf.mxu0  ;;  %v935_v0 = vpop.f32.mrf.mxu1 }
 0x215   :  { %2482 = vpow2.f32 %v2295_v60 }
 0x216   :  { %2484 = vtanh.f32 %v943_v47 }
 0x217   :  { %2486 = vpow2.f32 %v2296_v29 }
 0x220   :  { %v2481_v4 = vpop.eup %2480 }
 0x221   :  { %v948_v39 = vadd.f32 1.0, %v2481_v4 }
 0x222   :  { %v2483_v50 = vpop.eup %2482 }
 0x223   :  { %2488 = vrcp.f32 %v948_v39  ;;  %v954_v19 = vadd.f32 1.0, %v2483_v50  ;;  %v2485_v53 = vpop.eup %2484 }
 0x224   :  { %v2487_v54 = vpop.eup %2486 }
 0x225   :  { %2490 = vrcp.f32 %v954_v19  ;;  %v961_v42 = vadd.f32 1.0, %v2487_v54 }
 0x227   :  { %2492 = vrcp.f32 %v961_v42 }
 0x230   :  { %v2489_v57 = vpop.eup %2488 }
 0x231   :  { %v965_v61 = vmul.f32 %v2489_v57, %v2485_v53 }
 0x232   :  { %v2491_v63 = vpop.eup %2490 }
 0x233   :  { %v964_v58 = vmul.f32 %v2491_v63, %v3009_v9 }
 0x234   :  { %v2493_v43 = vpop.eup %2492 }
 0x235   :  { %v3067_v55 = vadd.f32 %v965_v61, %v964_v58 }
 0x237   :  { %2494 = vtanh.f32 %v3067_v55 }
 0x244   :  { %v2495_v60 = vpop.eup %2494 }
 0x245   :  { %v968_v62 = vmul.f32 %v2495_v60, %v2493_v43 }
 0x247   :  { %v974_v0 = vmul.f32 %v2383_v7, %v968_v62  ;;  %v1047_v3 = vpack.c.bf16 %v968_v62, %v968_v62 }
 0x249   :  { %v976_v2 = vcombine.high %v974_v0, %v974_v0  ;;  %v983_v59 = vrot.slane %v974_v0, %v3016_v5  ;;  %1081 = vmatmul.mubr.bf16.vlgmr.msra.gmra.mxu0 %v1047_v3  ;;  %1122 = vmatmul.mubr.bf16.vlgmr.msra.gmra.mxu1 %v1047_v3 }
 0x24a   :  { %1242 = vmatpush1.bf16.msra.mxu0 %v2771_v12  ;;  %1283 = vmatpush1.bf16.msra.mxu1 %v2773_v13 }
 0x24b   :  { %v990_v9 = vrot.slane %v976_v2, %v3016_v5  ;;  %v991_v47 = vcombine.high %v983_v59, %v983_v59  ;;  %v999_v29 = vrot.slane %v983_v59, %v3016_v5  ;;  %2297 = vst.sshfl [vmem:[#allocation9 + $0x1] sm:$0x1 pattern:$0x73625140] %v983_v59  ;;  %1243 = vmatprep.subr.bf16.mxu0 %v2776_v14 }
 0x24c   :  { %1284 = vmatprep.subr.bf16.mxu1 %v2779_v15  ;;  %1273 = vmatprep.mubr.bf16.mxu0 %v3440_v51 }
 0x24d   :  { %1314 = vmatprep.mubr.bf16.mxu1 %v3440_v51  ;;  %v992_v52 = vcombine.high %v990_v9, %v990_v9  ;;  %v1006_v4 = vrot.slane %v990_v9, %v3016_v5  ;;  %v1013_v12 = vrot.slane %v991_v47, %v3016_v5  ;;  %v1021_v13 = vcombine.high %v999_v29, %v999_v29 }
 0x24e   :  { %2298 = vst.sshfl [vmem:[#allocation9 + $0x9] sm:$0x1 pattern:$0x73625140] %v991_v47  ;;  %1244 = vmatpush1.bf16.msra.mxu0 %v2783_v16  ;;  %1285 = vmatpush1.bf16.msra.mxu1 %v2787_v17  ;;  %v1130_v16 = vunpack.c.l.bf16 %v2959_v1 }
 0x24f   :  { %2299 = vst.sshfl [vmem:[#allocation9 + $0x21] sm:$0x1 pattern:$0x73625140] %v990_v9  ;;  %v1020_v14 = vrot.slane %v992_v52, %v3016_v5  ;;  %v1022_v39 = vcombine.high %v1006_v4, %v1006_v4  ;;  %v1023_v15 = vcombine.high %v1013_v12, %v1013_v12  ;;  %1035 = vst [vmem:[#allocation9 + $0x11] sm:$0x1] %v1021_v13  ;;  %1245 = vmatprep.subr.bf16.mxu0 %v2791_v18 }
 0x250   :  { %2300 = vst.sshfl [vmem:[#allocation9 + $0x29] sm:$0x1 pattern:$0x73625140] %v992_v52  ;;  %1286 = vmatprep.subr.bf16.mxu1 %v2795_v20 }
 0x251   :  { %v1024_v50 = vcombine.high %v1020_v14, %v1020_v14  ;;  %1036 = vst [vmem:[#allocation9 + $0x19] sm:$0x1] %v1023_v15  ;;  %1039 = vst [vmem:[#allocation9 + $0x31] sm:$0x1] %v1022_v39  ;;  %v3119_v14 = vpop.permute.xlu0 %2385 }
 0x252   :  { %1246 = vmatpush1.bf16.msra.mxu0 %v2797_v21  ;;  %1287 = vmatpush1.bf16.msra.mxu1 %v2801_v22  ;;  %v1131_v21 = vunpack.c.h.bf16 %v2959_v1  ;;  %v2387_v15 = vunpack.i.l.bf16 %v3119_v14 }
 0x253   :  { %1040 = vst [vmem:[#allocation9 + $0x39] sm:$0x1] %v1024_v50  ;;  %1247 = vmatprep.subr.bf16.mxu0 %v2805_v23  ;;  %1288 = vmatprep.subr.bf16.mxu1 %v2807_v24 }
 0x256   :  { %1248 = vmatpush1.bf16.msra.mxu0 %v2811_v25  ;;  %1289 = vmatpush1.bf16.msra.mxu1 %v2815_v26 }
 0x257   :  { %1249 = vmatprep.subr.bf16.mxu0 %v2819_v27  ;;  %1290 = vmatprep.subr.bf16.mxu1 %v2821_v28 }
 0x25a   :  { %1250 = vmatpush1.bf16.msra.mxu0 %v2825_v30  ;;  %1291 = vmatpush1.bf16.msra.mxu1 %v2827_v31 }
 0x25b   :  { %1251 = vmatprep.subr.bf16.mxu0 %v2831_v32  ;;  %1292 = vmatprep.subr.bf16.mxu1 %v2835_v33 }
 0x25e   :  { %1252 = vmatpush1.bf16.msra.mxu0 %v2839_v34  ;;  %1293 = vmatpush1.bf16.msra.mxu1 %v2841_v35 }
 0x25f   :  { %1253 = vmatprep.subr.bf16.mxu0 %v2845_v36  ;;  %1294 = vmatprep.subr.bf16.mxu1 %v2849_v37 }
 0x262   :  { %1254 = vmatpush1.bf16.msra.mxu0 %v2862_v40  ;;  %1295 = vmatpush1.bf16.msra.mxu1 %v2864_v41 }
 0x263   :  { %1255 = vmatprep.subr.bf16.mxu0 %v2870_v45  ;;  %1296 = vmatprep.subr.bf16.mxu1 %v2872_v46 }
 0x266   :  { %1256 = vmatpush1.bf16.msra.mxu0 %v2878_v48  ;;  %1297 = vmatpush1.bf16.msra.mxu1 %v2880_v49 }
 0x267   :  { %1434 = vmatprep.subr.bf16.mxu0 %v2767_v10  ;;  %1475 = vmatprep.subr.bf16.mxu1 %v2769_v11  ;;  %v3442_v10 = vld [vmem:[#allocation13_spill] sm:$0xff] }
 0x268   :  { %v1133_v11 = vunpack.c.h.bf16 %v3442_v10  ;;  %v1132_v7 = vunpack.c.l.bf16 %v3442_v10 }
 0x309   :  { %v1082_v17 = vpop.f32.mrf.mxu0  ;;  %v1123_v18 = vpop.f32.mrf.mxu1 }
 0x30a   :  { %v1134_v20 = vadd.f32 %v1130_v16, %v1082_v17  ;;  %v1136_v60 = vadd.f32 %v1132_v7, %v1123_v18 }
 0x30b   :  { %v1084_v22 = vpop.f32.mrf.mxu0  ;;  %v1125_v19 = vpop.f32.mrf.mxu1 }
 0x30c   :  { %v2302_v53 = vmul.f32 -1.442695, %v1134_v20  ;;  %v1135_v54 = vadd.f32 %v1131_v21, %v1084_v22  ;;  %v1137_v43 = vadd.f32 %v1133_v11, %v1125_v19  ;;  %v3126_v22 = vld [vmem:[#allocation8 + $0xe8] ss:$16 sps:$4 sm:$0xff]   ;;  %v3141_v11 = vld [vmem:[#allocation8 + $0xc0] ss:$16 sps:$4 sm:$0xff]  }
 0x30d   :  { %v1086_v57 = vpop.f32.mrf.mxu0  ;;  %v1127_v61 = vpop.f32.mrf.mxu1 }
 0x30e   :  { %2496 = vpow2.f32 %v2302_v53  ;;  %v2303_v63 = vmul.f32 -1.442695, %v1135_v54  ;;  %v2304_v62 = vmul.f32 -1.442695, %v1137_v43  ;;  %v3131_v57 = vld [vmem:[#allocation8 + $0xc4] ss:$16 sps:$4 sm:$0xff]  }
 0x30f   :  { %v1087_v42 = vpop.f32.mrf.mxu0  ;;  %v1128_v58 = vpop.f32.mrf.mxu1  ;;  %v3134_v61 = vld [vmem:[#allocation8 + $0xcc] ss:$16 sps:$4 sm:$0xff]   ;;  %v3144_v43 = vld [vmem:[#allocation8 + $0xc8] ss:$16 sps:$4 sm:$0xff]  }
 0x310   :  { %2498 = vpow2.f32 %v2303_v63 }
 0x311   :  { %2500 = vtanh.f32 %v1136_v60 }
 0x312   :  { %2502 = vpow2.f32 %v2304_v62 }
 0x31b   :  { %v2497_v0 = vpop.eup %2496 }
 0x31c   :  { %v1141_v1 = vadd.f32 1.0, %v2497_v0  ;;  %v3148_v0 = vld [vmem:[#allocation8 + $0xa4] ss:$16 sps:$4 sm:$0xff]  }
 0x31d   :  { %v2499_v3 = vpop.eup %2498 }
 0x31e   :  { %2504 = vrcp.f32 %v1141_v1  ;;  %v1147_v2 = vadd.f32 1.0, %v2499_v3  ;;  %v2501_v59 = vpop.eup %2500  ;;  %v3151_v1 = vld [vmem:[#allocation8 + $0xac] ss:$16 sps:$4 sm:$0xff]  }
 0x31f   :  { %v2503_v9 = vpop.eup %2502 }
 0x320   :  { %2506 = vrcp.f32 %v1147_v2  ;;  %v1154_v4 = vadd.f32 1.0, %v2503_v9  ;;  %v3154_v2 = vld [vmem:[#allocation8 + $0xa0] ss:$16 sps:$4 sm:$0xff]  }
 0x322   :  { %2508 = vrcp.f32 %v1154_v4 }
 0x32b   :  { %v2505_v47 = vpop.eup %2504 }
 0x32c   :  { %v1158_v29 = vmul.f32 %v2505_v47, %v2501_v59  ;;  %v3157_v59 = vld [vmem:[#allocation8 + $0xa8] ss:$16 sps:$4 sm:$0xff]  }
 0x32d   :  { %v2507_v52 = vpop.eup %2506 }
 0x32e   :  { %v1157_v12 = vmul.f32 %v2507_v52, %v3067_v55  ;;  %v3123_v55 = vld [vmem:[#allocation8 + $0xe0] ss:$16 sps:$4 sm:$0xff]  }
 0x32f   :  { %v2509_v39 = vpop.eup %2508 }
 0x330   :  { %v3116_v13 = vadd.f32 %v1158_v29, %v1157_v12 }
 0x332   :  { %2510 = vtanh.f32 %v3116_v13 }
 0x33f   :  { %v2511_v50 = vpop.eup %2510 }
 0x340   :  { %v1161_v16 = vmul.f32 %v2511_v50, %v2509_v39 }
 0x342   :  { %v1167_v17 = vmul.f32 %v2387_v15, %v1161_v16  ;;  %v1240_v18 = vpack.c.bf16 %v1161_v16, %v1161_v16 }
 0x344   :  { %v1169_v20 = vcombine.high %v1167_v17, %v1167_v17  ;;  %v1176_v21 = vrot.slane %v1167_v17, %v3016_v5  ;;  %1274 = vmatmul.mubr.bf16.vlgmr.msra.gmra.mxu0 %v1240_v18  ;;  %1315 = vmatmul.mubr.bf16.vlgmr.msra.gmra.mxu1 %v1240_v18 }
 0x345   :  { %1435 = vmatpush1.bf16.msra.mxu0 %v3123_v55  ;;  %1476 = vmatpush1.bf16.msra.mxu1 %v3126_v22 }
 0x346   :  { %v1183_v19 = vrot.slane %v1169_v20, %v3016_v5  ;;  %v1184_v53 = vcombine.high %v1176_v21, %v1176_v21  ;;  %v1192_v54 = vrot.slane %v1176_v21, %v3016_v5  ;;  %2305 = vst.sshfl [vmem:[#allocation9 + $0x2] sm:$0x1 pattern:$0x73625140] %v1176_v21  ;;  %1436 = vmatprep.subr.bf16.mxu0 %v3131_v57 }
 0x347   :  { %1477 = vmatprep.subr.bf16.mxu1 %v3134_v61  ;;  %1466 = vmatprep.mubr.bf16.mxu0 %v3440_v51 }
 0x348   :  { %1507 = vmatprep.mubr.bf16.mxu1 %v3440_v51  ;;  %v1185_v63 = vcombine.high %v1183_v19, %v1183_v19  ;;  %v1199_v42 = vrot.slane %v1183_v19, %v3016_v5  ;;  %v1206_v58 = vrot.slane %v1184_v53, %v3016_v5  ;;  %v1214_v10 = vcombine.high %v1192_v54, %v1192_v54 }
 0x349   :  { %2306 = vst.sshfl [vmem:[#allocation9 + $0xa] sm:$0x1 pattern:$0x73625140] %v1184_v53  ;;  %1437 = vmatpush1.bf16.msra.mxu0 %v3141_v11  ;;  %1478 = vmatpush1.bf16.msra.mxu1 %v3144_v43 }
 0x34a   :  { %2307 = vst.sshfl [vmem:[#allocation9 + $0x22] sm:$0x1 pattern:$0x73625140] %v1183_v19  ;;  %v1213_v7 = vrot.slane %v1185_v63, %v3016_v5  ;;  %v1215_v60 = vcombine.high %v1199_v42, %v1199_v42  ;;  %v1216_v62 = vcombine.high %v1206_v58, %v1206_v58  ;;  %1228 = vst [vmem:[#allocation9 + $0x12] sm:$0x1] %v1214_v10  ;;  %1438 = vmatprep.subr.bf16.mxu0 %v3148_v0 }
 0x34b   :  { %2308 = vst.sshfl [vmem:[#allocation9 + $0x2a] sm:$0x1 pattern:$0x73625140] %v1185_v63  ;;  %1479 = vmatprep.subr.bf16.mxu1 %v3151_v1  ;;  %v2388_v42 = vunpack.i.h.bf16 %v3119_v14 }
 0x34c   :  { %v1217_v3 = vcombine.high %v1213_v7, %v1213_v7  ;;  %1229 = vst [vmem:[#allocation9 + $0x1a] sm:$0x1] %v1216_v62  ;;  %1232 = vst [vmem:[#allocation9 + $0x32] sm:$0x1] %v1215_v60 }
 0x34d   :  { %1439 = vmatpush1.bf16.msra.mxu0 %v3154_v2  ;;  %1480 = vmatpush1.bf16.msra.mxu1 %v3157_v59 }
 0x34e   :  { %1233 = vst [vmem:[#allocation9 + $0x3a] sm:$0x1] %v1217_v3  ;;  %1440 = vmatprep.subr.bf16.mxu0 %v2805_v23  ;;  %1481 = vmatprep.subr.bf16.mxu1 %v2807_v24  ;;  %v3180_v23 = vld [vmem:[#allocation8 + $0xe4] ss:$16 sps:$4 sm:$0xff]   ;;  %v3183_v24 = vld [vmem:[#allocation8 + $0xec] ss:$16 sps:$4 sm:$0xff]  }
 0x351   :  { %1441 = vmatpush1.bf16.msra.mxu0 %v2811_v25  ;;  %1482 = vmatpush1.bf16.msra.mxu1 %v2815_v26  ;;  %v2317_v25 = vsel %vm1430_vm5, 1.0, %v3441_v8  ;;  %v2325_v26 = vsel %vm1623_vm6, 1.0, %v3441_v8 }
 0x352   :  { %1442 = vmatprep.subr.bf16.mxu0 %v2819_v27  ;;  %1483 = vmatprep.subr.bf16.mxu1 %v2821_v28  ;;  %v2390_v27 = vpack.i.bf16 %v2325_v26, %v2317_v25  ;;  %v3443_v28 = vld [vmem:[#allocation14_spill] sm:$0xff] }
 0x354   :  { %2391 = vperm.xlu1 %2389, %v2390_v27  }
 0x355   :  { %1443 = vmatpush1.bf16.msra.mxu0 %v2825_v30  ;;  %1484 = vmatpush1.bf16.msra.mxu1 %v2827_v31  ;;  %v1323_v30 = vunpack.c.l.bf16 %v3443_v28 }
 0x356   :  { %1444 = vmatprep.subr.bf16.mxu0 %v2831_v32  ;;  %1485 = vmatprep.subr.bf16.mxu1 %v2835_v33 }
 0x359   :  { %1445 = vmatpush1.bf16.msra.mxu0 %v2839_v34  ;;  %1486 = vmatpush1.bf16.msra.mxu1 %v2841_v35  ;;  %v1324_v34 = vunpack.c.h.bf16 %v3443_v28 }
 0x35a   :  { %1446 = vmatprep.subr.bf16.mxu0 %v2845_v36  ;;  %1487 = vmatprep.subr.bf16.mxu1 %v2849_v37 }
 0x35d   :  { %1447 = vmatpush1.bf16.msra.mxu0 %v2862_v40  ;;  %1488 = vmatpush1.bf16.msra.mxu1 %v2864_v41 }
 0x35e   :  { %1448 = vmatprep.subr.bf16.mxu0 %v2870_v45  ;;  %1489 = vmatprep.subr.bf16.mxu1 %v2872_v46 }
 0x361   :  { %1449 = vmatpush1.bf16.msra.mxu0 %v2878_v48  ;;  %1490 = vmatpush1.bf16.msra.mxu1 %v2880_v49  ;;  %v3444_v49 = vld [vmem:[#allocation15_spill] sm:$0xff] }
 0x362   :  { %1627 = vmatprep.subr.bf16.mxu0 %v3180_v23  ;;  %1668 = vmatprep.subr.bf16.mxu1 %v3183_v24  ;;  %v1326_v9 = vunpack.c.h.bf16 %v3444_v49  ;;  %v1325_v29 = vunpack.c.l.bf16 %v3444_v49  ;;  %v3244_v49 = vld [vmem:[#allocation8 + $0x4c] ss:$16 sps:$4 sm:$0xff]  }
 0x404   :  { %v1275_v31 = vpop.f32.mrf.mxu0  ;;  %v1316_v32 = vpop.f32.mrf.mxu1 }
 0x405   :  { %v1327_v33 = vadd.f32 %v1323_v30, %v1275_v31  ;;  %v1329_v52 = vadd.f32 %v1325_v29, %v1316_v32  ;;  %v3253_v29 = vld [vmem:[#allocation8 + $0x24] ss:$16 sps:$4 sm:$0xff]  }
 0x406   :  { %v1277_v35 = vpop.f32.mrf.mxu0  ;;  %v1318_v36 = vpop.f32.mrf.mxu1 }
 0x407   :  { %v2310_v37 = vmul.f32 -1.442695, %v1327_v33  ;;  %v1328_v40 = vadd.f32 %v1324_v34, %v1277_v35  ;;  %v1330_v47 = vadd.f32 %v1326_v9, %v1318_v36  ;;  %v3217_v35 = vld [vmem:[#allocation8 + $0x84] ss:$16 sps:$4 sm:$0xff]   ;;  %v3220_v36 = vld [vmem:[#allocation8 + $0x8c] ss:$16 sps:$4 sm:$0xff]  }
 0x408   :  { %v1279_v41 = vpop.f32.mrf.mxu0  ;;  %v1320_v45 = vpop.f32.mrf.mxu1  ;;  %v3247_v9 = vld [vmem:[#allocation8 + $0x40] ss:$16 sps:$4 sm:$0xff]  }
 0x409   :  { %2512 = vpow2.f32 %v2310_v37  ;;  %v2311_v38 = vmul.f32 -1.442695, %v1328_v40  ;;  %v2312_v4 = vmul.f32 -1.442695, %v1330_v47  ;;  %v3223_v37 = vld [vmem:[#allocation8 + $0x80] ss:$16 sps:$4 sm:$0xff]  }
 0x40a   :  { %v1280_v46 = vpop.f32.mrf.mxu0  ;;  %v1321_v48 = vpop.f32.mrf.mxu1  ;;  %v3226_v40 = vld [vmem:[#allocation8 + $0x88] ss:$16 sps:$4 sm:$0xff]   ;;  %v3229_v41 = vld [vmem:[#allocation8 + $0x64] ss:$16 sps:$4 sm:$0xff]   ;;  %v3232_v45 = vld [vmem:[#allocation8 + $0x6c] ss:$16 sps:$4 sm:$0xff]  }
 0x40b   :  { %2514 = vpow2.f32 %v2311_v38  ;;  %v3235_v38 = vld [vmem:[#allocation8 + $0x60] ss:$16 sps:$4 sm:$0xff]   ;;  %v3238_v46 = vld [vmem:[#allocation8 + $0x68] ss:$16 sps:$4 sm:$0xff]   ;;  %v3241_v48 = vld [vmem:[#allocation8 + $0x44] ss:$16 sps:$4 sm:$0xff]  }
 0x40c   :  { %2516 = vtanh.f32 %v1329_v52  ;;  %v3250_v47 = vld [vmem:[#allocation8 + $0x48] ss:$16 sps:$4 sm:$0xff]   ;;  %v3256_v52 = vld [vmem:[#allocation8 + $0x2c] ss:$16 sps:$4 sm:$0xff]  }
 0x40d   :  { %2518 = vpow2.f32 %v2312_v4  ;;  %v3259_v4 = vld [vmem:[#allocation8 + $0x20] ss:$16 sps:$4 sm:$0xff]  }
 0x416   :  { %v2513_v12 = vpop.eup %2512 }
 0x417   :  { %v1334_v39 = vadd.f32 1.0, %v2513_v12  ;;  %v3262_v12 = vld [vmem:[#allocation8 + $0x28] ss:$16 sps:$4 sm:$0xff]  }
 0x418   :  { %v2515_v15 = vpop.eup %2514 }
 0x419   :  { %2520 = vrcp.f32 %v1334_v39  ;;  %v1340_v50 = vadd.f32 1.0, %v2515_v15  ;;  %v2517_v16 = vpop.eup %2516  ;;  %v3265_v39 = vld [vmem:[#allocation8 + $0x4] ss:$16 sps:$4 sm:$0xff]   ;;  %v3268_v15 = vld [vmem:[#allocation8 + $0xc] ss:$16 sps:$4 sm:$0xff]  }
 0x41a   :  { %v2519_v17 = vpop.eup %2518 }
 0x41b   :  { %2522 = vrcp.f32 %v1340_v50  ;;  %v1347_v19 = vadd.f32 1.0, %v2519_v17  ;;  %v3271_v50 = vld [vmem:[#allocation8] ss:$16 sps:$4 sm:$0xff]   ;;  %v3445_v17 = vld [vmem:[#allocation16_spill] sm:$0xff] }
 0x41d   :  { %2524 = vrcp.f32 %v1347_v19 }
 0x426   :  { %v2521_v18 = vpop.eup %2520 }
 0x427   :  { %v1351_v20 = vmul.f32 %v2521_v18, %v2517_v16  ;;  %v3274_v16 = vld [vmem:[#allocation8 + $0x8] ss:$16 sps:$4 sm:$0xff]   ;;  %v1516_v18 = vunpack.c.l.bf16 %v3445_v17 }
 0x428   :  { %v2523_v21 = vpop.eup %2522 }
 0x429   :  { %v1350_v53 = vmul.f32 %v2523_v21, %v3116_v13 }
 0x42a   :  { %v2525_v63 = vpop.eup %2524 }
 0x42b   :  { %v3195_v54 = vadd.f32 %v1351_v20, %v1350_v53  ;;  %v1517_v53 = vunpack.c.h.bf16 %v3445_v17 }
 0x42d   :  { %2526 = vtanh.f32 %v3195_v54 }
 0x43a   :  { %v2527_v58 = vpop.eup %2526 }
 0x43b   :  { %v1354_v10 = vmul.f32 %v2527_v58, %v2525_v63 }
 0x43d   :  { %v1360_v7 = vmul.f32 %v2388_v42, %v1354_v10  ;;  %v1433_v60 = vpack.c.bf16 %v1354_v10, %v1354_v10 }
 0x43f   :  { %v1362_v62 = vcombine.high %v1360_v7, %v1360_v7  ;;  %v1369_v3 = vrot.slane %v1360_v7, %v3016_v5  ;;  %1467 = vmatmul.mubr.bf16.vlgmr.msra.gmra.mxu0 %v1433_v60  ;;  %1508 = vmatmul.mubr.bf16.vlgmr.msra.gmra.mxu1 %v1433_v60 }
 0x440   :  { %1628 = vmatpush1.bf16.msra.mxu0 %v3123_v55  ;;  %1669 = vmatpush1.bf16.msra.mxu1 %v3126_v22 }
 0x441   :  { %v1376_v13 = vrot.slane %v1362_v62, %v3016_v5  ;;  %v1377_v25 = vcombine.high %v1369_v3, %v1369_v3  ;;  %v1385_v26 = vrot.slane %v1369_v3, %v3016_v5  ;;  %2313 = vst.sshfl [vmem:[#allocation9 + $0x3] sm:$0x1 pattern:$0x73625140] %v1369_v3  ;;  %1629 = vmatprep.subr.bf16.mxu0 %v3131_v57 }
 0x442   :  { %1670 = vmatprep.subr.bf16.mxu1 %v3134_v61  ;;  %1659 = vmatprep.mubr.bf16.mxu0 %v3440_v51 }
 0x443   :  { %1700 = vmatprep.mubr.bf16.mxu1 %v3440_v51  ;;  %v1378_v14 = vcombine.high %v1376_v13, %v1376_v13  ;;  %v1392_v27 = vrot.slane %v1376_v13, %v3016_v5  ;;  %v1399_v28 = vrot.slane %v1377_v25, %v3016_v5  ;;  %v1407_v30 = vcombine.high %v1385_v26, %v1385_v26 }
 0x444   :  { %2314 = vst.sshfl [vmem:[#allocation9 + $0xb] sm:$0x1 pattern:$0x73625140] %v1377_v25  ;;  %1630 = vmatpush1.bf16.msra.mxu0 %v3141_v11  ;;  %1671 = vmatpush1.bf16.msra.mxu1 %v3144_v43  ;;  %v3446_v25 = vld [vmem:[#allocation17_spill] sm:$0xff] }
 0x445   :  { %2315 = vst.sshfl [vmem:[#allocation9 + $0x23] sm:$0x1 pattern:$0x73625140] %v1376_v13  ;;  %v1406_v31 = vrot.slane %v1378_v14, %v3016_v5  ;;  %v1408_v32 = vcombine.high %v1392_v27, %v1392_v27  ;;  %v1409_v33 = vcombine.high %v1399_v28, %v1399_v28  ;;  %1421 = vst [vmem:[#allocation9 + $0x13] sm:$0x1] %v1407_v30  ;;  %1631 = vmatprep.subr.bf16.mxu0 %v3148_v0 }
 0x446   :  { %2316 = vst.sshfl [vmem:[#allocation9 + $0x2b] sm:$0x1 pattern:$0x73625140] %v1378_v14  ;;  %1672 = vmatprep.subr.bf16.mxu1 %v3151_v1  ;;  %v1519_v26 = vunpack.c.h.bf16 %v3446_v25  ;;  %v1518_v27 = vunpack.c.l.bf16 %v3446_v25 }
 0x447   :  { %v1410_v34 = vcombine.high %v1406_v31, %v1406_v31  ;;  %1422 = vst [vmem:[#allocation9 + $0x1b] sm:$0x1] %v1409_v33  ;;  %1425 = vst [vmem:[#allocation9 + $0x33] sm:$0x1] %v1408_v32 }
 0x448   :  { %1632 = vmatpush1.bf16.msra.mxu0 %v3154_v2  ;;  %1673 = vmatpush1.bf16.msra.mxu1 %v3157_v59 }
 0x449   :  { %1426 = vst [vmem:[#allocation9 + $0x3b] sm:$0x1] %v1410_v34  ;;  %1633 = vmatprep.subr.bf16.mxu0 %v3217_v35  ;;  %1674 = vmatprep.subr.bf16.mxu1 %v3220_v36 }
 0x44c   :  { %1634 = vmatpush1.bf16.msra.mxu0 %v3223_v37  ;;  %1675 = vmatpush1.bf16.msra.mxu1 %v3226_v40 }
 0x44d   :  { %1635 = vmatprep.subr.bf16.mxu0 %v3229_v41  ;;  %1676 = vmatprep.subr.bf16.mxu1 %v3232_v45 }
 0x450   :  { %1636 = vmatpush1.bf16.msra.mxu0 %v3235_v38  ;;  %1677 = vmatpush1.bf16.msra.mxu1 %v3238_v46 }
 0x451   :  { %1637 = vmatprep.subr.bf16.mxu0 %v3241_v48  ;;  %1678 = vmatprep.subr.bf16.mxu1 %v3244_v49 }
 0x454   :  { %1638 = vmatpush1.bf16.msra.mxu0 %v3247_v9  ;;  %1679 = vmatpush1.bf16.msra.mxu1 %v3250_v47 }
 0x455   :  { %1639 = vmatprep.subr.bf16.mxu0 %v3253_v29  ;;  %1680 = vmatprep.subr.bf16.mxu1 %v3256_v52 }
 0x458   :  { %1640 = vmatpush1.bf16.msra.mxu0 %v3259_v4  ;;  %1681 = vmatpush1.bf16.msra.mxu1 %v3262_v12 }
 0x459   :  { %1641 = vmatprep.subr.bf16.mxu0 %v3265_v39  ;;  %1682 = vmatprep.subr.bf16.mxu1 %v3268_v15 }
 0x45c   :  { %1642 = vmatpush1.bf16.msra.mxu0 %v3271_v50  ;;  %1683 = vmatpush1.bf16.msra.mxu1 %v3274_v16 }
 0x45d   :  { %1820 = vmatprep.subr.bf16.mxu0 %v3180_v23  ;;  %1861 = vmatprep.subr.bf16.mxu1 %v3183_v24 }
 0x4ff   :  { %v1468_v20 = vpop.f32.mrf.mxu0  ;;  %v1509_v21 = vpop.f32.mrf.mxu1 }
 0x500   :  { %v1520_v19 = vadd.f32 %v1516_v18, %v1468_v20  ;;  %v1522_v28 = vadd.f32 %v1518_v27, %v1509_v21  ;;  %v3287_v21 = vpop.permute.xlu1 %2391 }
 0x501   :  { %v1470_v63 = vpop.f32.mrf.mxu0  ;;  %v1511_v42 = vpop.f32.mrf.mxu1 }
 0x502   :  { %v2318_v58 = vmul.f32 -1.442695, %v1520_v19  ;;  %v1521_v10 = vadd.f32 %v1517_v53, %v1470_v63  ;;  %v1523_v14 = vadd.f32 %v1519_v26, %v1511_v42 }
 0x503   :  { %v1472_v7 = vpop.f32.mrf.mxu0  ;;  %v1513_v60 = vpop.f32.mrf.mxu1 }
 0x504   :  { %2528 = vpow2.f32 %v2318_v58  ;;  %v2319_v62 = vmul.f32 -1.442695, %v1521_v10  ;;  %v2320_v30 = vmul.f32 -1.442695, %v1523_v14  ;;  %v2393_v7 = vunpack.i.l.bf16 %v3287_v21 }
 0x505   :  { %v1473_v3 = vpop.f32.mrf.mxu0  ;;  %v1514_v13 = vpop.f32.mrf.mxu1 }
 0x506   :  { %2530 = vpow2.f32 %v2319_v62 }
 0x507   :  { %2532 = vtanh.f32 %v1522_v28 }
 0x508   :  { %2534 = vpow2.f32 %v2320_v30 }
 0x511   :  { %v2529_v31 = vpop.eup %2528 }
 0x512   :  { %v1527_v32 = vadd.f32 1.0, %v2529_v31 }
 0x513   :  { %v2531_v33 = vpop.eup %2530 }
 0x514   :  { %2536 = vrcp.f32 %v1527_v32  ;;  %v1533_v34 = vadd.f32 1.0, %v2531_v33  ;;  %v2533_v17 = vpop.eup %2532 }
 0x515   :  { %v2535_v18 = vpop.eup %2534 }
 0x516   :  { %2538 = vrcp.f32 %v1533_v34  ;;  %v1540_v63 = vadd.f32 1.0, %v2535_v18 }
 0x518   :  { %2540 = vrcp.f32 %v1540_v63 }
 0x521   :  { %v2537_v20 = vpop.eup %2536 }
 0x522   :  { %v1544_v19 = vmul.f32 %v2537_v20, %v2533_v17  ;;  %v2624_v20 = vld [vmem:[%s3415_s1] sm:$0xff]  ;;  %s2721_s1 = smov [#allocation9]  }
 0x523   :  { %v2539_v53 = vpop.eup %2538  ;;  %vm1816_vm7 = vcmp.gt.s32.totalorder %v2624_v20, 6  ;;  %vm2009_vm8 = vcmp.gt.s32.totalorder %v2624_v20, 7  ;;  %s2204_s14 = sshll.u32 %s2721_s1, 4  ;;  %s2205_s14 = int_to_ptr.vmem [resolvable:$true] %s2204_s14 }
 0x524   :  { %v1543_v42 = vmul.f32 %v2539_v53, %v3195_v54  ;;  %v2341_v53 = vsel %vm2009_vm8, 1.0, %v3441_v8  ;;  %s2685_s15 = scalar_lea.vmem %s2205_s14, 1024  ;;  %p2690_p2 = scmp.lt.s32.totalorder %s2205_s14, %s2205_s14 }
 0x525   :  { %v2541_v10 = vpop.eup %2540  ;;  %p2686_p1 = scmp.ne.s32.totalorder %s2205_s14, %s2685_s15  ;;  %p2691_p3 = scmp.lt.s32.totalorder %s2685_s15, %s2685_s15 }
 0x526   :  { %v3284_v58 = vadd.f32 %v1544_v19, %v1543_v42  ;;  %v2333_v19 = vsel %vm1816_vm7, 1.0, %v3441_v8  ;;  %v1709_v42 = vunpack.c.l.bf16 %v2985_v44  ;;  %v3447_v8 = vld [vmem:[#allocation18_spill] sm:$0xff] }
 0x527   :  { %v2395_v63 = vpack.i.bf16 %v2341_v53, %v2333_v19  ;;  %p2692_p4 = por %p2691_p3, %p2690_p2 }
 0x528   :  { %2542 = vtanh.f32 %v3284_v58 }
 0x529   :  { %2396 = vperm.xlu1 %2389, %v2395_v63   ;;  %p2693_p5 = pnand %p2692_p4, %p2686_p1 }
 0x535   :  { %v2543_v60 = vpop.eup %2542 }
 0x536   :  { %v1547_v62 = vmul.f32 %v2543_v60, %v2541_v10 }
 0x538   :  { %v1553_v3 = vmul.f32 %v2393_v7, %v1547_v62  ;;  %v1626_v13 = vpack.c.bf16 %v1547_v62, %v1547_v62 }
 0x53a   :  { %v1555_v25 = vcombine.high %v1553_v3, %v1553_v3  ;;  %v1562_v26 = vrot.slane %v1553_v3, %v3016_v5  ;;  %1660 = vmatmul.mubr.bf16.vlgmr.msra.gmra.mxu0 %v1626_v13  ;;  %1701 = vmatmul.mubr.bf16.vlgmr.msra.gmra.mxu1 %v1626_v13 }
 0x53b   :  { %1821 = vmatpush1.bf16.msra.mxu0 %v3123_v55  ;;  %1862 = vmatpush1.bf16.msra.mxu1 %v3126_v22 }
 0x53c   :  { %v1569_v54 = vrot.slane %v1555_v25, %v3016_v5  ;;  %v1570_v14 = vcombine.high %v1562_v26, %v1562_v26  ;;  %v1578_v27 = vrot.slane %v1562_v26, %v3016_v5  ;;  %2321 = vst.sshfl [vmem:[#allocation9 + $0x4] sm:$0x1 pattern:$0x73625140] %v1562_v26  ;;  %1822 = vmatprep.subr.bf16.mxu0 %v3131_v57 }
 0x53d   :  { %1863 = vmatprep.subr.bf16.mxu1 %v3134_v61  ;;  %1852 = vmatprep.mubr.bf16.mxu0 %v3440_v51 }
 0x53e   :  { %1893 = vmatprep.mubr.bf16.mxu1 %v3440_v51  ;;  %v1571_v28 = vcombine.high %v1569_v54, %v1569_v54  ;;  %v1585_v30 = vrot.slane %v1569_v54, %v3016_v5  ;;  %v1592_v31 = vrot.slane %v1570_v14, %v3016_v5  ;;  %v1600_v32 = vcombine.high %v1578_v27, %v1578_v27 }
 0x53f   :  { %2322 = vst.sshfl [vmem:[#allocation9 + $0xc] sm:$0x1 pattern:$0x73625140] %v1570_v14  ;;  %1823 = vmatpush1.bf16.msra.mxu0 %v3141_v11  ;;  %1864 = vmatpush1.bf16.msra.mxu1 %v3144_v43 }
 0x540   :  { %2323 = vst.sshfl [vmem:[#allocation9 + $0x24] sm:$0x1 pattern:$0x73625140] %v1569_v54  ;;  %v1599_v33 = vrot.slane %v1571_v28, %v3016_v5  ;;  %v1601_v34 = vcombine.high %v1585_v30, %v1585_v30  ;;  %v1602_v17 = vcombine.high %v1592_v31, %v1592_v31  ;;  %1614 = vst [vmem:[#allocation9 + $0x14] sm:$0x1] %v1600_v32  ;;  %1824 = vmatprep.subr.bf16.mxu0 %v3148_v0 }
 0x541   :  { %2324 = vst.sshfl [vmem:[#allocation9 + $0x2c] sm:$0x1 pattern:$0x73625140] %v1571_v28  ;;  %1865 = vmatprep.subr.bf16.mxu1 %v3151_v1  ;;  %v1712_v28 = vunpack.c.h.bf16 %v3447_v8  ;;  %v1711_v31 = vunpack.c.l.bf16 %v3447_v8 }
 0x542   :  { %v1603_v18 = vcombine.high %v1599_v33, %v1599_v33  ;;  %1615 = vst [vmem:[#allocation9 + $0x1c] sm:$0x1] %v1602_v17  ;;  %1618 = vst [vmem:[#allocation9 + $0x34] sm:$0x1] %v1601_v34 }
 0x543   :  { %1825 = vmatpush1.bf16.msra.mxu0 %v3154_v2  ;;  %1866 = vmatpush1.bf16.msra.mxu1 %v3157_v59 }
 0x544   :  { %1619 = vst [vmem:[#allocation9 + $0x3c] sm:$0x1] %v1603_v18  ;;  %1826 = vmatprep.subr.bf16.mxu0 %v3217_v35  ;;  %1867 = vmatprep.subr.bf16.mxu1 %v3220_v36 }
 0x547   :  { %1827 = vmatpush1.bf16.msra.mxu0 %v3223_v37  ;;  %1868 = vmatpush1.bf16.msra.mxu1 %v3226_v40 }
 0x548   :  { %1828 = vmatprep.subr.bf16.mxu0 %v3229_v41  ;;  %1869 = vmatprep.subr.bf16.mxu1 %v3232_v45 }
 0x54b   :  { %1829 = vmatpush1.bf16.msra.mxu0 %v3235_v38  ;;  %1870 = vmatpush1.bf16.msra.mxu1 %v3238_v46 }
 0x54c   :  { %1830 = vmatprep.subr.bf16.mxu0 %v3241_v48  ;;  %1871 = vmatprep.subr.bf16.mxu1 %v3244_v49 }
 0x54f   :  { %1831 = vmatpush1.bf16.msra.mxu0 %v3247_v9  ;;  %1872 = vmatpush1.bf16.msra.mxu1 %v3250_v47 }
 0x550   :  { %1832 = vmatprep.subr.bf16.mxu0 %v3253_v29  ;;  %1873 = vmatprep.subr.bf16.mxu1 %v3256_v52 }
 0x553   :  { %1833 = vmatpush1.bf16.msra.mxu0 %v3259_v4  ;;  %1874 = vmatpush1.bf16.msra.mxu1 %v3262_v12 }
 0x554   :  { %1834 = vmatprep.subr.bf16.mxu0 %v3265_v39  ;;  %1875 = vmatprep.subr.bf16.mxu1 %v3268_v15 }
 0x557   :  { %1835 = vmatpush1.bf16.msra.mxu0 %v3271_v50  ;;  %1876 = vmatpush1.bf16.msra.mxu1 %v3274_v16 }
 0x558   :  { %2013 = vmatprep.subr.bf16.mxu0 %v3180_v23  ;;  %2054 = vmatprep.subr.bf16.mxu1 %v3183_v24  ;;  %v1710_v23 = vunpack.c.h.bf16 %v2985_v44 }
 0x5fa   :  { %v1661_v10 = vpop.f32.mrf.mxu0  ;;  %v1702_v7 = vpop.f32.mrf.mxu1 }
 0x5fb   :  { %v1713_v60 = vadd.f32 %v1709_v42, %v1661_v10  ;;  %v1715_v32 = vadd.f32 %v1711_v31, %v1702_v7 }
 0x5fc   :  { %v1663_v24 = vpop.f32.mrf.mxu0  ;;  %v1704_v62 = vpop.f32.mrf.mxu1 }
 0x5fd   :  { %v2326_v3 = vmul.f32 -1.442695, %v1713_v60  ;;  %v1714_v13 = vadd.f32 %v1710_v23, %v1663_v24  ;;  %v1716_v30 = vadd.f32 %v1712_v28, %v1704_v62  ;;  %v2394_v24 = vunpack.i.h.bf16 %v3287_v21 }
 0x5fe   :  { %v1665_v25 = vpop.f32.mrf.mxu0  ;;  %v1706_v26 = vpop.f32.mrf.mxu1 }
 0x5ff   :  { %2544 = vpow2.f32 %v2326_v3  ;;  %v2327_v54 = vmul.f32 -1.442695, %v1714_v13  ;;  %v2328_v33 = vmul.f32 -1.442695, %v1716_v30 }
 0x600   :  { %v1666_v14 = vpop.f32.mrf.mxu0  ;;  %v1707_v27 = vpop.f32.mrf.mxu1 }
 0x601   :  { %2546 = vpow2.f32 %v2327_v54 }
 0x602   :  { %2548 = vtanh.f32 %v1715_v32 }
 0x603   :  { %2550 = vpow2.f32 %v2328_v33 }
 0x60c   :  { %v2545_v34 = vpop.eup %2544 }
 0x60d   :  { %v1720_v44 = vadd.f32 1.0, %v2545_v34 }
 0x60e   :  { %v2547_v17 = vpop.eup %2546 }
 0x60f   :  { %2552 = vrcp.f32 %v1720_v44  ;;  %v1726_v18 = vadd.f32 1.0, %v2547_v17  ;;  %v2549_v20 = vpop.eup %2548  ;;  %v3390_v44 = vpop.permute.xlu1 %2396 }
 0x610   :  { %v2551_v19 = vpop.eup %2550 }
 0x611   :  { %2554 = vrcp.f32 %v1726_v18  ;;  %v1733_v10 = vadd.f32 1.0, %v2551_v19  ;;  %v2398_v18 = vunpack.i.l.bf16 %v3390_v44 }
 0x613   :  { %2556 = vrcp.f32 %v1733_v10 }
 0x61c   :  { %v2553_v53 = vpop.eup %2552 }
 0x61d   :  { %v1737_v63 = vmul.f32 %v2553_v53, %v2549_v20 }
 0x61e   :  { %v2555_v42 = vpop.eup %2554 }
 0x61f   :  { %v1736_v60 = vmul.f32 %v2555_v42, %v3284_v58 }
 0x620   :  { %v2557_v7 = vpop.eup %2556 }
 0x621   :  { %v3340_v23 = vadd.f32 %v1737_v63, %v1736_v60 }
 0x623   :  { %2558 = vtanh.f32 %v3340_v23 }
 0x630   :  { %v2559_v62 = vpop.eup %2558 }
 0x631   :  { %v1740_v3 = vmul.f32 %v2559_v62, %v2557_v7 }
 0x633   :  { %v1746_v13 = vmul.f32 %v2394_v24, %v1740_v3  ;;  %v1819_v25 = vpack.c.bf16 %v1740_v3, %v1740_v3 }
 0x635   :  { %v1748_v26 = vcombine.high %v1746_v13, %v1746_v13  ;;  %v1755_v54 = vrot.slane %v1746_v13, %v3016_v5  ;;  %1853 = vmatmul.mubr.bf16.vlgmr.msra.gmra.mxu0 %v1819_v25  ;;  %1894 = vmatmul.mubr.bf16.vlgmr.msra.gmra.mxu1 %v1819_v25 }
 0x636   :  { %2014 = vmatpush1.bf16.msra.mxu0 %v3123_v55  ;;  %2055 = vmatpush1.bf16.msra.mxu1 %v3126_v22 }
 0x637   :  { %v1762_v58 = vrot.slane %v1748_v26, %v3016_v5  ;;  %v1763_v14 = vcombine.high %v1755_v54, %v1755_v54  ;;  %v1771_v27 = vrot.slane %v1755_v54, %v3016_v5  ;;  %2329 = vst.sshfl [vmem:[#allocation9 + $0x5] sm:$0x1 pattern:$0x73625140] %v1755_v54  ;;  %2015 = vmatprep.subr.bf16.mxu0 %v3131_v57 }
 0x638   :  { %2056 = vmatprep.subr.bf16.mxu1 %v3134_v61  ;;  %2045 = vmatprep.mubr.bf16.mxu0 %v3440_v51 }
 0x639   :  { %2086 = vmatprep.mubr.bf16.mxu1 %v3440_v51  ;;  %v1764_v21 = vcombine.high %v1762_v58, %v1762_v58  ;;  %v1778_v8 = vrot.slane %v1762_v58, %v3016_v5  ;;  %v1785_v55 = vrot.slane %v1763_v14, %v3016_v5  ;;  %v1793_v22 = vcombine.high %v1771_v27, %v1771_v27 }
 0x63a   :  { %2330 = vst.sshfl [vmem:[#allocation9 + $0xd] sm:$0x1 pattern:$0x73625140] %v1763_v14  ;;  %2016 = vmatpush1.bf16.msra.mxu0 %v3141_v11  ;;  %2057 = vmatpush1.bf16.msra.mxu1 %v3144_v43  ;;  %v1902_v11 = vunpack.c.l.bf16 %v2993_v56  ;;  %v2095_v14 = vunpack.c.l.bf16 %v3001_v6 }
 0x63b   :  { %2331 = vst.sshfl [vmem:[#allocation9 + $0x25] sm:$0x1 pattern:$0x73625140] %v1762_v58  ;;  %v1792_v57 = vrot.slane %v1764_v21, %v3016_v5  ;;  %v1794_v28 = vcombine.high %v1778_v8, %v1778_v8  ;;  %v1795_v61 = vcombine.high %v1785_v55, %v1785_v55  ;;  %1807 = vst [vmem:[#allocation9 + $0x15] sm:$0x1] %v1793_v22  ;;  %2017 = vmatprep.subr.bf16.mxu0 %v3148_v0 }
 0x63c   :  { %2332 = vst.sshfl [vmem:[#allocation9 + $0x2d] sm:$0x1 pattern:$0x73625140] %v1764_v21  ;;  %2058 = vmatprep.subr.bf16.mxu1 %v3151_v1  ;;  %v2096_v55 = vunpack.c.h.bf16 %v3001_v6 }
 0x63d   :  { %v1796_v51 = vcombine.high %v1792_v57, %v1792_v57  ;;  %1808 = vst [vmem:[#allocation9 + $0x1d] sm:$0x1] %v1795_v61  ;;  %1811 = vst [vmem:[#allocation9 + $0x35] sm:$0x1] %v1794_v28 }
 0x63e   :  { %2018 = vmatpush1.bf16.msra.mxu0 %v3154_v2  ;;  %2059 = vmatpush1.bf16.msra.mxu1 %v3157_v59  ;;  %v1903_v2 = vunpack.c.h.bf16 %v2993_v56 }
 0x63f   :  { %1812 = vst [vmem:[#allocation9 + $0x3d] sm:$0x1] %v1796_v51  ;;  %2019 = vmatprep.subr.bf16.mxu0 %v3217_v35  ;;  %2060 = vmatprep.subr.bf16.mxu1 %v3220_v36 }
 0x642   :  { %2020 = vmatpush1.bf16.msra.mxu0 %v3223_v37  ;;  %2061 = vmatpush1.bf16.msra.mxu1 %v3226_v40 }
 0x643   :  { %2021 = vmatprep.subr.bf16.mxu0 %v3229_v41  ;;  %2062 = vmatprep.subr.bf16.mxu1 %v3232_v45 }
 0x646   :  { %2022 = vmatpush1.bf16.msra.mxu0 %v3235_v38  ;;  %2063 = vmatpush1.bf16.msra.mxu1 %v3238_v46 }
 0x647   :  { %2023 = vmatprep.subr.bf16.mxu0 %v3241_v48  ;;  %2064 = vmatprep.subr.bf16.mxu1 %v3244_v49  ;;  %v3448_v48 = vld [vmem:[#allocation19_spill] sm:$0xff] }
 0x648   :  { %v1905_v49 = vunpack.c.h.bf16 %v3448_v48 }
 0x64a   :  { %2024 = vmatpush1.bf16.msra.mxu0 %v3247_v9  ;;  %2065 = vmatpush1.bf16.msra.mxu1 %v3250_v47  ;;  %v1904_v47 = vunpack.c.l.bf16 %v3448_v48 }
 0x64b   :  { %2025 = vmatprep.subr.bf16.mxu0 %v3253_v29  ;;  %2066 = vmatprep.subr.bf16.mxu1 %v3256_v52 }
 0x64e   :  { %2026 = vmatpush1.bf16.msra.mxu0 %v3259_v4  ;;  %2067 = vmatpush1.bf16.msra.mxu1 %v3262_v12 }
 0x64f   :  { %2027 = vmatprep.subr.bf16.mxu0 %v3265_v39  ;;  %2068 = vmatprep.subr.bf16.mxu1 %v3268_v15 }
 0x652   :  { %2028 = vmatpush1.bf16.msra.mxu0 %v3271_v50  ;;  %2069 = vmatpush1.bf16.msra.mxu1 %v3274_v16 }
 0x6f5   :  { %v1854_v43 = vpop.f32.mrf.mxu0  ;;  %v1895_v0 = vpop.f32.mrf.mxu1 }
 0x6f6   :  { %v1906_v1 = vadd.f32 %v1902_v11, %v1854_v43  ;;  %v1908_v29 = vadd.f32 %v1904_v47, %v1895_v0 }
 0x6f7   :  { %v1856_v59 = vpop.f32.mrf.mxu0  ;;  %v1897_v35 = vpop.f32.mrf.mxu1 }
 0x6f8   :  { %v2334_v36 = vmul.f32 -1.442695, %v1906_v1  ;;  %v1907_v37 = vadd.f32 %v1903_v2, %v1856_v59  ;;  %v1909_v9 = vadd.f32 %v1905_v49, %v1897_v35  ;;  %v3449_v2 = vld [vmem:[#allocation20_spill] sm:$0xff] }
 0x6f9   :  { %v1858_v40 = vpop.f32.mrf.mxu0  ;;  %v1899_v41 = vpop.f32.mrf.mxu1  ;;  %v2098_v59 = vunpack.c.h.bf16 %v3449_v2 }
 0x6fa   :  { %2560 = vpow2.f32 %v2334_v36  ;;  %v2335_v45 = vmul.f32 -1.442695, %v1907_v37  ;;  %v2336_v52 = vmul.f32 -1.442695, %v1909_v9  ;;  %v2097_v36 = vunpack.c.l.bf16 %v3449_v2 }
 0x6fb   :  { %v1859_v38 = vpop.f32.mrf.mxu0  ;;  %v1900_v46 = vpop.f32.mrf.mxu1 }
 0x6fc   :  { %2562 = vpow2.f32 %v2335_v45 }
 0x6fd   :  { %2564 = vtanh.f32 %v1908_v29 }
 0x6fe   :  { %2566 = vpow2.f32 %v2336_v52 }
 0x707   :  { %v2561_v4 = vpop.eup %2560 }
 0x708   :  { %v1913_v56 = vadd.f32 1.0, %v2561_v4 }
 0x709   :  { %v2563_v12 = vpop.eup %2562 }
 0x70a   :  { %2568 = vrcp.f32 %v1913_v56  ;;  %v1919_v39 = vadd.f32 1.0, %v2563_v12  ;;  %v2565_v15 = vpop.eup %2564 }
 0x70b   :  { %v2567_v50 = vpop.eup %2566 }
 0x70c   :  { %2570 = vrcp.f32 %v1919_v39  ;;  %v1926_v32 = vadd.f32 1.0, %v2567_v50  ;;  %v2399_v39 = vunpack.i.h.bf16 %v3390_v44 }
 0x70e   :  { %2572 = vrcp.f32 %v1926_v32 }
 0x717   :  { %v2569_v16 = vpop.eup %2568 }
 0x718   :  { %v1930_v30 = vmul.f32 %v2569_v16, %v2565_v15 }
 0x719   :  { %v2571_v31 = vpop.eup %2570 }
 0x71a   :  { %v1929_v33 = vmul.f32 %v2571_v31, %v3340_v23 }
 0x71b   :  { %v2573_v17 = vpop.eup %2572 }
 0x71c   :  { %v3387_v34 = vadd.f32 %v1930_v30, %v1929_v33 }
 0x71e   :  { %2574 = vtanh.f32 %v3387_v34 }
 0x72b   :  { %v2575_v20 = vpop.eup %2574 }
 0x72c   :  { %v1933_v19 = vmul.f32 %v2575_v20, %v2573_v17 }
 0x72e   :  { %v1939_v53 = vmul.f32 %v2398_v18, %v1933_v19  ;;  %v2012_v63 = vpack.c.bf16 %v1933_v19, %v1933_v19 }
 0x730   :  { %v1941_v42 = vcombine.high %v1939_v53, %v1939_v53  ;;  %v1948_v10 = vrot.slane %v1939_v53, %v3016_v5  ;;  %2046 = vmatmul.mubr.bf16.vlgmr.msra.gmra.mxu0 %v2012_v63  ;;  %2087 = vmatmul.mubr.bf16.vlgmr.msra.gmra.mxu1 %v2012_v63 }
 0x732   :  { %v1955_v60 = vrot.slane %v1941_v42, %v3016_v5  ;;  %v1956_v23 = vcombine.high %v1948_v10, %v1948_v10  ;;  %v1964_v7 = vrot.slane %v1948_v10, %v3016_v5  ;;  %2337 = vst.sshfl [vmem:[#allocation9 + $0x6] sm:$0x1 pattern:$0x73625140] %v1948_v10 }
 0x734   :  { %v1957_v24 = vcombine.high %v1955_v60, %v1955_v60  ;;  %v1971_v62 = vrot.slane %v1955_v60, %v3016_v5  ;;  %v1978_v3 = vrot.slane %v1956_v23, %v3016_v5  ;;  %v1986_v13 = vcombine.high %v1964_v7, %v1964_v7  ;;  %2338 = vst.sshfl [vmem:[#allocation9 + $0xe] sm:$0x1 pattern:$0x73625140] %v1956_v23 }
 0x735   :  { %2339 = vst.sshfl [vmem:[#allocation9 + $0x26] sm:$0x1 pattern:$0x73625140] %v1955_v60 }
 0x736   :  { %v1985_v25 = vrot.slane %v1957_v24, %v3016_v5  ;;  %v1987_v26 = vcombine.high %v1971_v62, %v1971_v62  ;;  %v1988_v54 = vcombine.high %v1978_v3, %v1978_v3  ;;  %2000 = vst [vmem:[#allocation9 + $0x16] sm:$0x1] %v1986_v13  ;;  %2340 = vst.sshfl [vmem:[#allocation9 + $0x2e] sm:$0x1 pattern:$0x73625140] %v1957_v24 }
 0x738   :  { %v1989_v58 = vcombine.high %v1985_v25, %v1985_v25  ;;  %2001 = vst [vmem:[#allocation9 + $0x1e] sm:$0x1] %v1988_v54  ;;  %2004 = vst [vmem:[#allocation9 + $0x36] sm:$0x1] %v1987_v26 }
 0x73a   :  { %2005 = vst [vmem:[#allocation9 + $0x3e] sm:$0x1] %v1989_v58 }
 0x7f0   :  { %v2047_v27 = vpop.f32.mrf.mxu0  ;;  %v2088_v21 = vpop.f32.mrf.mxu1 }
 0x7f1   :  { %v2099_v8 = vadd.f32 %v2095_v14, %v2047_v27  ;;  %v2101_v37 = vadd.f32 %v2097_v36, %v2088_v21 }
 0x7f2   :  { %v2049_v22 = vpop.f32.mrf.mxu0  ;;  %v2090_v57 = vpop.f32.mrf.mxu1 }
 0x7f3   :  { %v2342_v28 = vmul.f32 -1.442695, %v2099_v8  ;;  %v2100_v61 = vadd.f32 %v2096_v55, %v2049_v22  ;;  %v2102_v35 = vadd.f32 %v2098_v59, %v2090_v57 }
 0x7f4   :  { %v2051_v51 = vpop.f32.mrf.mxu0  ;;  %v2092_v11 = vpop.f32.mrf.mxu1 }
 0x7f5   :  { %2576 = vpow2.f32 %v2342_v28  ;;  %v2343_v43 = vmul.f32 -1.442695, %v2100_v61  ;;  %v2344_v40 = vmul.f32 -1.442695, %v2102_v35 }
 0x7f6   :  { %v2052_v0 = vpop.f32.mrf.mxu0  ;;  %v2093_v1 = vpop.f32.mrf.mxu1 }
 0x7f7   :  { %2578 = vpow2.f32 %v2343_v43 }
 0x7f8   :  { %2580 = vtanh.f32 %v2101_v37 }
 0x7f9   :  { %2582 = vpow2.f32 %v2344_v40 }
 0x802   :  { %v2577_v41 = vpop.eup %2576 }
 0x803   :  { %v2106_v6 = vadd.f32 1.0, %v2577_v41 }
 0x804   :  { %v2579_v45 = vpop.eup %2578 }
 0x805   :  { %2584 = vrcp.f32 %v2106_v6  ;;  %v2112_v38 = vadd.f32 1.0, %v2579_v45  ;;  %v2581_v46 = vpop.eup %2580 }
 0x806   :  { %v2583_v48 = vpop.eup %2582 }
 0x807   :  { %2586 = vrcp.f32 %v2112_v38  ;;  %v2119_v29 = vadd.f32 1.0, %v2583_v48 }
 0x809   :  { %2588 = vrcp.f32 %v2119_v29 }
 0x812   :  { %v2585_v49 = vpop.eup %2584 }
 0x813   :  { %v2123_v9 = vmul.f32 %v2585_v49, %v2581_v46 }
 0x814   :  { %v2587_v47 = vpop.eup %2586 }
 0x815   :  { %v2122_v52 = vmul.f32 %v2587_v47, %v3387_v34 }
 0x816   :  { %v2589_v56 = vpop.eup %2588 }
 0x817   :  { %v2124_v4 = vadd.f32 %v2123_v9, %v2122_v52 }
 0x819   :  { %2590 = vtanh.f32 %v2124_v4 }
 0x826   :  { %v2591_v12 = vpop.eup %2590 }
 0x827   :  { %v2126_v15 = vmul.f32 %v2591_v12, %v2589_v56 }
 0x829   :  { %v2132_v50 = vmul.f32 %v2399_v39, %v2126_v15 }
 0x82b   :  { %v2134_v16 = vcombine.high %v2132_v50, %v2132_v50  ;;  %v2141_v30 = vrot.slane %v2132_v50, %v3016_v5 }
 0x82d   :  { %v2148_v31 = vrot.slane %v2134_v16, %v3016_v5  ;;  %v2149_v32 = vcombine.high %v2141_v30, %v2141_v30  ;;  %v2157_v33 = vrot.slane %v2141_v30, %v3016_v5  ;;  %2345 = vst.sshfl [vmem:[#allocation9 + $0x7] sm:$0x1 pattern:$0x73625140] %v2141_v30 }
 0x82f   :  { %v2150_v17 = vcombine.high %v2148_v31, %v2148_v31  ;;  %v2164_v34 = vrot.slane %v2148_v31, %v3016_v5  ;;  %v2171_v18 = vrot.slane %v2149_v32, %v3016_v5  ;;  %v2179_v20 = vcombine.high %v2157_v33, %v2157_v33  ;;  %2346 = vst.sshfl [vmem:[#allocation9 + $0xf] sm:$0x1 pattern:$0x73625140] %v2149_v32 }
 0x830   :  { %2347 = vst.sshfl [vmem:[#allocation9 + $0x27] sm:$0x1 pattern:$0x73625140] %v2148_v31 }
 0x831   :  { %v2178_v44 = vrot.slane %v2150_v17, %v3016_v5  ;;  %v2180_v19 = vcombine.high %v2164_v34, %v2164_v34  ;;  %v2181_v53 = vcombine.high %v2171_v18, %v2171_v18  ;;  %2193 = vst [vmem:[#allocation9 + $0x17] sm:$0x1] %v2179_v20  ;;  %2348 = vst.sshfl [vmem:[#allocation9 + $0x2f] sm:$0x1 pattern:$0x73625140] %v2150_v17 }
 0x833   :  { %v2182_v63 = vcombine.high %v2178_v44, %v2178_v44  ;;  %2194 = vst [vmem:[#allocation9 + $0x1f] sm:$0x1] %v2181_v53  ;;  %2197 = vst [vmem:[#allocation9 + $0x37] sm:$0x1] %v2180_v19 }
 0x835   :  { %2198 = vst [vmem:[#allocation9 + $0x3f] sm:$0x1] %v2182_v63 }
 0x836   :  { %2696 = shalt.err (!%p2693_p5)
}
 0x837   :  { %s2722_s16 = smov 128   ;;  %s2723_s17 = smov 8  }
 0x838   :  { %2210 = dma.vmem_to_hbm [thread:$0]  %s2205_s14, 1024, %s3419_s5, [#allocation5], %s2722_s16, %s2722_s16, %s2723_s17  }
 0x839   :  { %2709 = dma.done.wait [#allocation5], 1024  }
 0x83a   :  { %2710 = vsyncadd [#allocation5], 4294966272 }
 0x83b   :  { %2214 = vsyncpa [#allocation4], 1 }
 0x83c   :  { %2215 = vsyncpa [#allocation7], 1 }
 0x83d   :  { %2216 = vsyncpa [#allocation5], 1 }

</bundles_post_ra>
